<compile_context>
chip_gen: v7x
topology: tpu7x:2x2x1
jax: 0.10.0
libtpu: 0.0.40
codegen_flags: <defaults>
</compile_context>

<pallas_src>
import jax
import jax.numpy as jnp
from jax import lax
from jax.experimental import pallas as pl
from jax.experimental.pallas import tpu as pltpu


def _basic_block_kernel(x_ref, w1_ref, s1_ref, b1_ref, w2_ref, s2_ref, b2_ref,
                        o_ref, xsh_ref, hsh_ref):
    """One image per grid step: conv3x3+BN+ReLU -> conv3x3+BN+res+ReLU."""
    _, H, W, Cin = x_ref.shape
    Cmid = w1_ref.shape[2]
    Cout = w2_ref.shape[2]
    cdt = xsh_ref.dtype                      # bf16 compute dtype (MXU operands)

    x_img = x_ref[0]                         # (H, W, Cin), input dtype (f32)

    def build_shifted(img, c, sh_ref):
        """sh_ref[y, x, dx*c + ch] = zero-padded img[y-1, x-1+dx, ch].

        Width taps are folded onto the lane axis, so the dy taps of the 3x3
        conv become plain major-axis row offsets of sh_ref.
        """
        v = img.astype(cdt)                              # (H, W, c)
        zcol = jnp.zeros((H, 1, c), cdt)
        left = jnp.concatenate([zcol, v[:, :W - 1, :]], axis=1)   # dx = 0
        right = jnp.concatenate([v[:, 1:, :], zcol], axis=1)      # dx = 2
        # Zero only the top/bottom halo rows; the interior is fully rewritten.
        zrow = jnp.zeros((W, 3 * c), cdt)
        sh_ref[0] = zrow
        sh_ref[H + 1] = zrow
        sh_ref[1:H + 1] = jnp.concatenate([left, v, right], axis=-1)

    def conv3x3(sh_ref, w_ref):
        """3 MXU matmuls (one per dy), K = 3*C, f32 accumulation."""
        k = sh_ref.shape[2]
        def patch(dy):
            return sh_ref[dy:dy + H].reshape(H * W, k)   # free view (W%8==0)
        acc = jnp.dot(patch(0), w_ref[0], preferred_element_type=jnp.float32)
        acc = acc + jnp.dot(patch(1), w_ref[1],
                            preferred_element_type=jnp.float32)
        acc = acc + jnp.dot(patch(2), w_ref[2],
                            preferred_element_type=jnp.float32)
        return acc                                       # (H*W, N) f32

    # ---- conv1 -> BN1 (folded scale/shift) -> ReLU ----
    build_shifted(x_img, Cin, xsh_ref)
    acc1 = conv3x3(xsh_ref, w1_ref)
    h = jnp.maximum(acc1 * s1_ref[...] + b1_ref[...], 0.0)   # (H*W, Cmid) f32

    # ---- conv2 -> BN2 -> +residual -> ReLU ----
    build_shifted(h.reshape(H, W, Cmid), Cmid, hsh_ref)
    acc2 = conv3x3(hsh_ref, w2_ref)
    residual = x_img.reshape(H * W, Cin).astype(jnp.float32)
    out = jnp.maximum(acc2 * s2_ref[...] + b2_ref[...] + residual, 0.0)
    o_ref[0] = out.reshape(H, W, Cout).astype(o_ref.dtype)


def _fold_bn(gamma, beta, mean, var, eps):
    scale = gamma / jnp.sqrt(var + eps)
    shift = beta - mean * scale
    return scale, shift


@jax.jit
def basic_block_forward_nhwc(x, w1, g1, be1, m1, v1, w2, g2, be2, m2, v2,
                             eps=1e-5):
    """BasicBlock forward, NHWC in / NHWC out (the Pallas hot path)."""
    N, H, W, Cin = x.shape
    Cmid = w1.shape[0]
    Cout = w2.shape[0]
    assert Cin == Cout, "identity residual requires inplanes == planes"
    assert W % 8 == 0, "kernel assumes W multiple of 8 (f32 sublane tile)"

    s1, sh1 = _fold_bn(g1, be1, m1, v1, eps)
    s2, sh2 = _fold_bn(g2, be2, m2, v2, eps)

    # PyTorch conv weight (O, I, kh, kw) -> (kh, kw*I, O): width taps folded
    # into the contraction dim. bf16 operands, f32 accumulation in-kernel.
    w1_k = jnp.transpose(w1, (2, 3, 1, 0)).reshape(3, 3 * Cin, Cmid)
    w2_k = jnp.transpose(w2, (2, 3, 1, 0)).reshape(3, 3 * Cmid, Cout)
    w1_k = w1_k.astype(jnp.bfloat16)
    w2_k = w2_k.astype(jnp.bfloat16)
    s1_k = s1.reshape(1, Cmid).astype(jnp.float32)
    sh1_k = sh1.reshape(1, Cmid).astype(jnp.float32)
    s2_k = s2.reshape(1, Cout).astype(jnp.float32)
    sh2_k = sh2.reshape(1, Cout).astype(jnp.float32)

    itemsize = x.dtype.itemsize
    flops = 2 * N * H * W * 9 * (Cin * Cmid + Cmid * Cout)
    bytes_accessed = (x.size * itemsize + N * H * W * Cout * itemsize
                      + (w1_k.size + w2_k.size) * 2
                      + (s1_k.size + sh1_k.size + s2_k.size + sh2_k.size) * 4)

    # Explicit VMEM budget: double-buffered in/out blocks + bf16 shifted
    # scratches + f32 acc/h temps + weights, with 2x headroom.
    blk_in = H * W * Cin * itemsize
    blk_out = H * W * Cout * itemsize
    scratch = (H + 2) * W * 3 * (Cin + Cmid) * 2
    temps = H * W * (2 * max(Cmid, Cout) * 4 + 2 * 3 * max(Cin, Cmid) * 2)
    weights = (w1_k.size + w2_k.size) * 2 * 2
    budget = 2 * (blk_in + blk_out) + scratch + temps + weights
    vmem_limit = int(min(max(2 * budget, 32 << 20), 128 << 20))

    out = pl.pallas_call(
        _basic_block_kernel,
        out_shape=jax.ShapeDtypeStruct((N, H, W, Cout), x.dtype),
        grid_spec=pltpu.PrefetchScalarGridSpec(
            num_scalar_prefetch=0,
            grid=(N,),
            in_specs=[
                pl.BlockSpec((1, H, W, Cin), lambda n: (n, 0, 0, 0)),
                pl.BlockSpec((3, 3 * Cin, Cmid), lambda n: (0, 0, 0)),
                pl.BlockSpec((1, Cmid), lambda n: (0, 0)),
                pl.BlockSpec((1, Cmid), lambda n: (0, 0)),
                pl.BlockSpec((3, 3 * Cmid, Cout), lambda n: (0, 0, 0)),
                pl.BlockSpec((1, Cout), lambda n: (0, 0)),
                pl.BlockSpec((1, Cout), lambda n: (0, 0)),
            ],
            out_specs=pl.BlockSpec((1, H, W, Cout), lambda n: (n, 0, 0, 0)),
            scratch_shapes=[
                pltpu.VMEM((H + 2, W, 3 * Cin), jnp.bfloat16),
                pltpu.VMEM((H + 2, W, 3 * Cmid), jnp.bfloat16),
            ],
        ),
        compiler_params=pltpu.CompilerParams(
            dimension_semantics=("parallel",),   # batch split across TCs (v7x)
            vmem_limit_bytes=vmem_limit,
        ),
        cost_estimate=pl.CostEstimate(
            flops=flops, transcendentals=0, bytes_accessed=int(bytes_accessed)),
    )(x, w1_k, s1_k, sh1_k, w2_k, s2_k, sh2_k)
    return out


def basic_block_forward(x_nchw, *params, eps=1e-5):
    """NCHW adaptor matching the PyTorch module interface.

    The transposes here are layout plumbing only; at the model level keep
    activations NHWC across consecutive blocks and call
    basic_block_forward_nhwc directly to avoid the extra HBM round trips.
    """
    x_nhwc = jnp.transpose(x_nchw, (0, 2, 3, 1))
    y = basic_block_forward_nhwc(x_nhwc, *params, eps=eps)
    return jnp.transpose(y, (0, 3, 1, 2))


def _reference_basic_block(x, w1, g1, be1, m1, v1, w2, g2, be2, m2, v2,
                           eps=1e-5):
    """Pure-JAX reference (eval-mode BN folded the same way)."""
    s1, sh1 = _fold_bn(g1, be1, m1, v1, eps)
    s2, sh2 = _fold_bn(g2, be2, m2, v2, eps)
    dn = lax.conv_dimension_numbers(x.shape, w1.shape, ("NCHW", "OIHW", "NCHW"))
    y = lax.conv_general_dilated(x, w1, (1, 1), ((1, 1), (1, 1)),
                                 dimension_numbers=dn,
                                 precision=lax.Precision.HIGHEST)
    y = jnp.maximum(y * s1[None, :, None, None] + sh1[None, :, None, None], 0.0)
    z = lax.conv_general_dilated(y, w2, (1, 1), ((1, 1), (1, 1)),
                                 dimension_numbers=dn,
                                 precision=lax.Precision.HIGHEST)
    z = z * s2[None, :, None, None] + sh2[None, :, None, None]
    return jnp.maximum(z + x, 0.0)


if __name__ == "__main__":
    key = jax.random.PRNGKey(0)
    keys = jax.random.split(key, 11)
    N, C, H, W = 2, 4, 16, 16  # inplanes == planes == 4, stride=1

    x = jax.random.normal(keys[0], (N, C, H, W), dtype=jnp.float32)
    w1 = 0.3 * jax.random.normal(keys[1], (C, C, 3, 3), dtype=jnp.float32)
    w2 = 0.3 * jax.random.normal(keys[2], (C, C, 3, 3), dtype=jnp.float32)
    g1 = 1.0 + 0.1 * jax.random.normal(keys[3], (C,), dtype=jnp.float32)
    be1 = 0.1 * jax.random.normal(keys[4], (C,), dtype=jnp.float32)
    m1 = 0.1 * jax.random.normal(keys[5], (C,), dtype=jnp.float32)
    v1 = 1.0 + 0.1 * jnp.abs(jax.random.normal(keys[6], (C,), dtype=jnp.float32))
    g2 = 1.0 + 0.1 * jax.random.normal(keys[7], (C,), dtype=jnp.float32)
    be2 = 0.1 * jax.random.normal(keys[8], (C,), dtype=jnp.float32)
    m2 = 0.1 * jax.random.normal(keys[9], (C,), dtype=jnp.float32)
    v2 = 1.0 + 0.1 * jnp.abs(jax.random.normal(keys[10], (C,), dtype=jnp.float32))

    y = basic_block_forward(x, w1, g1, be1, m1, v1, w2, g2, be2, m2, v2)
    y = jax.block_until_ready(y)

    y_ref = _reference_basic_block(x, w1, g1, be1, m1, v1, w2, g2, be2, m2, v2)
    y_ref = jax.block_until_ready(y_ref)

    assert y.shape == x.shape and y.dtype == x.dtype
    max_err = float(jnp.max(jnp.abs(y - y_ref)))
    scale = float(jnp.max(jnp.abs(y_ref))) + 1e-6
    # Tolerance absorbs bf16 MXU operands (f32 accumulation / f32 epilogues)
    # vs the HIGHEST-precision XLA reference; structural bugs (wrong taps,
    # weights, or residual) produce O(1) relative error.
    assert max_err / scale < 2e-2, (max_err, scale)
    print("KERNEL_OK")
</pallas_src>

<mosaic_0001>
module attributes {stable_mosaic.version = 11 : i64} {
  func.func @_basic_block_kernel(%arg0: i32, %arg1: memref<1x16x16x4xf32, #tpu.memory_space<vmem>>, %arg2: memref<3x12x4xbf16, #tpu.memory_space<vmem>>, %arg3: memref<1x4xf32, #tpu.memory_space<vmem>>, %arg4: memref<1x4xf32, #tpu.memory_space<vmem>>, %arg5: memref<3x12x4xbf16, #tpu.memory_space<vmem>>, %arg6: memref<1x4xf32, #tpu.memory_space<vmem>>, %arg7: memref<1x4xf32, #tpu.memory_space<vmem>>, %arg8: memref<1x16x16x4xf32, #tpu.memory_space<vmem>>, %arg9: memref<18x16x12xbf16, #tpu.memory_space<vmem>>, %arg10: memref<18x16x12xbf16, #tpu.memory_space<vmem>>) attributes {dimension_semantics = [#tpu.dimension_semantics<parallel>], iteration_bounds = array<i64: 2>, scalar_prefetch = 0 : i64, scratch_operands = 2 : i64, tpu.core_type = #tpu.core_type<tc>, window_params = [{transform_indices = @transform_0, window_bounds = array<i64: 1, 16, 16, 4>}, {pipeline_mode = #tpu.pipeline_mode<synchronous>, transform_indices = @transform_1, window_bounds = array<i64: 3, 12, 4>}, {pipeline_mode = #tpu.pipeline_mode<synchronous>, transform_indices = @transform_2, window_bounds = array<i64: 1, 4>}, {pipeline_mode = #tpu.pipeline_mode<synchronous>, transform_indices = @transform_3, window_bounds = array<i64: 1, 4>}, {pipeline_mode = #tpu.pipeline_mode<synchronous>, transform_indices = @transform_4, window_bounds = array<i64: 3, 12, 4>}, {pipeline_mode = #tpu.pipeline_mode<synchronous>, transform_indices = @transform_5, window_bounds = array<i64: 1, 4>}, {pipeline_mode = #tpu.pipeline_mode<synchronous>, transform_indices = @transform_6, window_bounds = array<i64: 1, 4>}, {transform_indices = @transform_7, window_bounds = array<i64: 1, 16, 16, 4>}]} {
    %c0 = arith.constant 0 : index
    %c0_0 = arith.constant 0 : index
    %c0_1 = arith.constant 0 : index
    %c0_2 = arith.constant 0 : index
    %0 = vector.load %arg1[%c0, %c0_0, %c0_1, %c0_2] : memref<1x16x16x4xf32, #tpu.memory_space<vmem>>, vector<1x16x16x4xf32>
    %1 = vector.shape_cast %0 : vector<1x16x16x4xf32> to vector<16x16x4xf32>
    %2 = arith.truncf %1 : vector<16x16x4xf32> to vector<16x16x4xbf16>
    %cst = arith.constant 0.000000e+00 : bf16
    %3 = vector.broadcast %cst : bf16 to vector<16x1x4xbf16>
    %4 = vector.extract_strided_slice %2 {offsets = [0, 0, 0], sizes = [16, 15, 4], strides = [1, 1, 1]} : vector<16x16x4xbf16> to vector<16x15x4xbf16>
    %5 = tpu.concatenate %3, %4 in 1 : vector<16x1x4xbf16>, vector<16x15x4xbf16> -> vector<16x16x4xbf16>
    %6 = vector.extract_strided_slice %2 {offsets = [0, 1, 0], sizes = [16, 15, 4], strides = [1, 1, 1]} : vector<16x16x4xbf16> to vector<16x15x4xbf16>
    %7 = tpu.concatenate %6, %3 in 1 : vector<16x15x4xbf16>, vector<16x1x4xbf16> -> vector<16x16x4xbf16>
    %cst_3 = arith.constant 0.000000e+00 : bf16
    %8 = vector.broadcast %cst_3 : bf16 to vector<16x12xbf16>
    %c0_4 = arith.constant 0 : index
    %c0_5 = arith.constant 0 : index
    %c0_6 = arith.constant 0 : index
    %9 = vector.load %arg9[%c0_4, %c0_5, %c0_6] : memref<18x16x12xbf16, #tpu.memory_space<vmem>>, vector<1x16x12xbf16>
    %10 = vector.shape_cast %9 : vector<1x16x12xbf16> to vector<16x12xbf16>
    %11 = vector.shape_cast %8 : vector<16x12xbf16> to vector<1x16x12xbf16>
    tpu.vector_store %arg9[%c0_4, %c0_5, %c0_6], %11 {strides = array<i32>} : memref<18x16x12xbf16, #tpu.memory_space<vmem>>, vector<1x16x12xbf16>,
    %c17 = arith.constant 17 : index
    %c0_7 = arith.constant 0 : index
    %c0_8 = arith.constant 0 : index
    %12 = vector.load %arg9[%c17, %c0_7, %c0_8] : memref<18x16x12xbf16, #tpu.memory_space<vmem>>, vector<1x16x12xbf16>
    %13 = vector.shape_cast %12 : vector<1x16x12xbf16> to vector<16x12xbf16>
    %14 = vector.shape_cast %8 : vector<16x12xbf16> to vector<1x16x12xbf16>
    tpu.vector_store %arg9[%c17, %c0_7, %c0_8], %14 {strides = array<i32>} : memref<18x16x12xbf16, #tpu.memory_space<vmem>>, vector<1x16x12xbf16>,
    %15 = tpu.concatenate %5, %2, %7 in 2 : vector<16x16x4xbf16>, vector<16x16x4xbf16>, vector<16x16x4xbf16> -> vector<16x16x12xbf16>
    %c1 = arith.constant 1 : index
    %c0_9 = arith.constant 0 : index
    %c0_10 = arith.constant 0 : index
    %16 = vector.load %arg9[%c1, %c0_9, %c0_10] : memref<18x16x12xbf16, #tpu.memory_space<vmem>>, vector<16x16x12xbf16>
    tpu.vector_store %arg9[%c1, %c0_9, %c0_10], %15 {strides = array<i32>} : memref<18x16x12xbf16, #tpu.memory_space<vmem>>, vector<16x16x12xbf16>,
    %c0_11 = arith.constant 0 : index
    %c0_12 = arith.constant 0 : index
    %c0_13 = arith.constant 0 : index
    %17 = vector.load %arg9[%c0_11, %c0_12, %c0_13] : memref<18x16x12xbf16, #tpu.memory_space<vmem>>, vector<16x16x12xbf16>
    %18 = vector.shape_cast %17 : vector<16x16x12xbf16> to vector<256x12xbf16>
    %c0_14 = arith.constant 0 : index
    %c0_15 = arith.constant 0 : index
    %c0_16 = arith.constant 0 : index
    %19 = vector.load %arg2[%c0_14, %c0_15, %c0_16] : memref<3x12x4xbf16, #tpu.memory_space<vmem>>, vector<1x12x4xbf16>
    %20 = vector.shape_cast %19 : vector<1x12x4xbf16> to vector<12x4xbf16>
    %cst_17 = arith.constant dense<0.000000e+00> : vector<256x4xf32>
    %21 = tpu.matmul %18, %20, %cst_17 {dimension_numbers = #tpu.dot_dimension_numbers<[1], [0], [0], [1], [0, 0, 1, 1], [], []>} : vector<256x12xbf16>, vector<12x4xbf16>, vector<256x4xf32> -> vector<256x4xf32>
    %c1_18 = arith.constant 1 : index
    %c0_19 = arith.constant 0 : index
    %c0_20 = arith.constant 0 : index
    %22 = vector.load %arg9[%c1_18, %c0_19, %c0_20] : memref<18x16x12xbf16, #tpu.memory_space<vmem>>, vector<16x16x12xbf16>
    %23 = vector.shape_cast %22 : vector<16x16x12xbf16> to vector<256x12xbf16>
    %c1_21 = arith.constant 1 : index
    %c0_22 = arith.constant 0 : index
    %c0_23 = arith.constant 0 : index
    %24 = vector.load %arg2[%c1_21, %c0_22, %c0_23] : memref<3x12x4xbf16, #tpu.memory_space<vmem>>, vector<1x12x4xbf16>
    %25 = vector.shape_cast %24 : vector<1x12x4xbf16> to vector<12x4xbf16>
    %cst_24 = arith.constant dense<0.000000e+00> : vector<256x4xf32>
    %26 = tpu.matmul %23, %25, %cst_24 {dimension_numbers = #tpu.dot_dimension_numbers<[1], [0], [0], [1], [0, 0, 1, 1], [], []>} : vector<256x12xbf16>, vector<12x4xbf16>, vector<256x4xf32> -> vector<256x4xf32>
    %27 = arith.addf %21, %26 : vector<256x4xf32>
    %c2 = arith.constant 2 : index
    %c0_25 = arith.constant 0 : index
    %c0_26 = arith.constant 0 : index
    %28 = vector.load %arg9[%c2, %c0_25, %c0_26] : memref<18x16x12xbf16, #tpu.memory_space<vmem>>, vector<16x16x12xbf16>
    %29 = vector.shape_cast %28 : vector<16x16x12xbf16> to vector<256x12xbf16>
    %c2_27 = arith.constant 2 : index
    %c0_28 = arith.constant 0 : index
    %c0_29 = arith.constant 0 : index
    %30 = vector.load %arg2[%c2_27, %c0_28, %c0_29] : memref<3x12x4xbf16, #tpu.memory_space<vmem>>, vector<1x12x4xbf16>
    %31 = vector.shape_cast %30 : vector<1x12x4xbf16> to vector<12x4xbf16>
    %cst_30 = arith.constant dense<0.000000e+00> : vector<256x4xf32>
    %32 = tpu.matmul %29, %31, %cst_30 {dimension_numbers = #tpu.dot_dimension_numbers<[1], [0], [0], [1], [0, 0, 1, 1], [], []>} : vector<256x12xbf16>, vector<12x4xbf16>, vector<256x4xf32> -> vector<256x4xf32>
    %33 = arith.addf %27, %32 : vector<256x4xf32>
    %c0_31 = arith.constant 0 : index
    %c0_32 = arith.constant 0 : index
    %34 = vector.load %arg3[%c0_31, %c0_32] : memref<1x4xf32, #tpu.memory_space<vmem>>, vector<1x4xf32>
    %35 = vector.broadcast %34 : vector<1x4xf32> to vector<256x4xf32>
    %36 = arith.mulf %33, %35 : vector<256x4xf32>
    %c0_33 = arith.constant 0 : index
    %c0_34 = arith.constant 0 : index
    %37 = vector.load %arg4[%c0_33, %c0_34] : memref<1x4xf32, #tpu.memory_space<vmem>>, vector<1x4xf32>
    %38 = vector.broadcast %37 : vector<1x4xf32> to vector<256x4xf32>
    %39 = arith.addf %36, %38 : vector<256x4xf32>
    %cst_35 = arith.constant 0.000000e+00 : f32
    %40 = vector.broadcast %cst_35 : f32 to vector<256x4xf32>
    %41 = arith.maximumf %39, %40 : vector<256x4xf32>
    %42 = vector.shape_cast %41 : vector<256x4xf32> to vector<16x16x4xf32>
    %43 = arith.truncf %42 : vector<16x16x4xf32> to vector<16x16x4xbf16>
    %cst_36 = arith.constant 0.000000e+00 : bf16
    %44 = vector.broadcast %cst_36 : bf16 to vector<16x1x4xbf16>
    %45 = vector.extract_strided_slice %43 {offsets = [0, 0, 0], sizes = [16, 15, 4], strides = [1, 1, 1]} : vector<16x16x4xbf16> to vector<16x15x4xbf16>
    %46 = tpu.concatenate %44, %45 in 1 : vector<16x1x4xbf16>, vector<16x15x4xbf16> -> vector<16x16x4xbf16>
    %47 = vector.extract_strided_slice %43 {offsets = [0, 1, 0], sizes = [16, 15, 4], strides = [1, 1, 1]} : vector<16x16x4xbf16> to vector<16x15x4xbf16>
    %48 = tpu.concatenate %47, %44 in 1 : vector<16x15x4xbf16>, vector<16x1x4xbf16> -> vector<16x16x4xbf16>
    %cst_37 = arith.constant 0.000000e+00 : bf16
    %49 = vector.broadcast %cst_37 : bf16 to vector<16x12xbf16>
    %c0_38 = arith.constant 0 : index
    %c0_39 = arith.constant 0 : index
    %c0_40 = arith.constant 0 : index
    %50 = vector.load %arg10[%c0_38, %c0_39, %c0_40] : memref<18x16x12xbf16, #tpu.memory_space<vmem>>, vector<1x16x12xbf16>
    %51 = vector.shape_cast %50 : vector<1x16x12xbf16> to vector<16x12xbf16>
    %52 = vector.shape_cast %49 : vector<16x12xbf16> to vector<1x16x12xbf16>
    tpu.vector_store %arg10[%c0_38, %c0_39, %c0_40], %52 {strides = array<i32>} : memref<18x16x12xbf16, #tpu.memory_space<vmem>>, vector<1x16x12xbf16>,
    %c17_41 = arith.constant 17 : index
    %c0_42 = arith.constant 0 : index
    %c0_43 = arith.constant 0 : index
    %53 = vector.load %arg10[%c17_41, %c0_42, %c0_43] : memref<18x16x12xbf16, #tpu.memory_space<vmem>>, vector<1x16x12xbf16>
    %54 = vector.shape_cast %53 : vector<1x16x12xbf16> to vector<16x12xbf16>
    %55 = vector.shape_cast %49 : vector<16x12xbf16> to vector<1x16x12xbf16>
    tpu.vector_store %arg10[%c17_41, %c0_42, %c0_43], %55 {strides = array<i32>} : memref<18x16x12xbf16, #tpu.memory_space<vmem>>, vector<1x16x12xbf16>,
    %56 = tpu.concatenate %46, %43, %48 in 2 : vector<16x16x4xbf16>, vector<16x16x4xbf16>, vector<16x16x4xbf16> -> vector<16x16x12xbf16>
    %c1_44 = arith.constant 1 : index
    %c0_45 = arith.constant 0 : index
    %c0_46 = arith.constant 0 : index
    %57 = vector.load %arg10[%c1_44, %c0_45, %c0_46] : memref<18x16x12xbf16, #tpu.memory_space<vmem>>, vector<16x16x12xbf16>
    tpu.vector_store %arg10[%c1_44, %c0_45, %c0_46], %56 {strides = array<i32>} : memref<18x16x12xbf16, #tpu.memory_space<vmem>>, vector<16x16x12xbf16>,
    %c0_47 = arith.constant 0 : index
    %c0_48 = arith.constant 0 : index
    %c0_49 = arith.constant 0 : index
    %58 = vector.load %arg10[%c0_47, %c0_48, %c0_49] : memref<18x16x12xbf16, #tpu.memory_space<vmem>>, vector<16x16x12xbf16>
    %59 = vector.shape_cast %58 : vector<16x16x12xbf16> to vector<256x12xbf16>
    %c0_50 = arith.constant 0 : index
    %c0_51 = arith.constant 0 : index
    %c0_52 = arith.constant 0 : index
    %60 = vector.load %arg5[%c0_50, %c0_51, %c0_52] : memref<3x12x4xbf16, #tpu.memory_space<vmem>>, vector<1x12x4xbf16>
    %61 = vector.shape_cast %60 : vector<1x12x4xbf16> to vector<12x4xbf16>
    %cst_53 = arith.constant dense<0.000000e+00> : vector<256x4xf32>
    %62 = tpu.matmul %59, %61, %cst_53 {dimension_numbers = #tpu.dot_dimension_numbers<[1], [0], [0], [1], [0, 0, 1, 1], [], []>} : vector<256x12xbf16>, vector<12x4xbf16>, vector<256x4xf32> -> vector<256x4xf32>
    %c1_54 = arith.constant 1 : index
    %c0_55 = arith.constant 0 : index
    %c0_56 = arith.constant 0 : index
    %63 = vector.load %arg10[%c1_54, %c0_55, %c0_56] : memref<18x16x12xbf16, #tpu.memory_space<vmem>>, vector<16x16x12xbf16>
    %64 = vector.shape_cast %63 : vector<16x16x12xbf16> to vector<256x12xbf16>
    %c1_57 = arith.constant 1 : index
    %c0_58 = arith.constant 0 : index
    %c0_59 = arith.constant 0 : index
    %65 = vector.load %arg5[%c1_57, %c0_58, %c0_59] : memref<3x12x4xbf16, #tpu.memory_space<vmem>>, vector<1x12x4xbf16>
    %66 = vector.shape_cast %65 : vector<1x12x4xbf16> to vector<12x4xbf16>
    %cst_60 = arith.constant dense<0.000000e+00> : vector<256x4xf32>
    %67 = tpu.matmul %64, %66, %cst_60 {dimension_numbers = #tpu.dot_dimension_numbers<[1], [0], [0], [1], [0, 0, 1, 1], [], []>} : vector<256x12xbf16>, vector<12x4xbf16>, vector<256x4xf32> -> vector<256x4xf32>
    %68 = arith.addf %62, %67 : vector<256x4xf32>
    %c2_61 = arith.constant 2 : index
    %c0_62 = arith.constant 0 : index
    %c0_63 = arith.constant 0 : index
    %69 = vector.load %arg10[%c2_61, %c0_62, %c0_63] : memref<18x16x12xbf16, #tpu.memory_space<vmem>>, vector<16x16x12xbf16>
    %70 = vector.shape_cast %69 : vector<16x16x12xbf16> to vector<256x12xbf16>
    %c2_64 = arith.constant 2 : index
    %c0_65 = arith.constant 0 : index
    %c0_66 = arith.constant 0 : index
    %71 = vector.load %arg5[%c2_64, %c0_65, %c0_66] : memref<3x12x4xbf16, #tpu.memory_space<vmem>>, vector<1x12x4xbf16>
    %72 = vector.shape_cast %71 : vector<1x12x4xbf16> to vector<12x4xbf16>
    %cst_67 = arith.constant dense<0.000000e+00> : vector<256x4xf32>
    %73 = tpu.matmul %70, %72, %cst_67 {dimension_numbers = #tpu.dot_dimension_numbers<[1], [0], [0], [1], [0, 0, 1, 1], [], []>} : vector<256x12xbf16>, vector<12x4xbf16>, vector<256x4xf32> -> vector<256x4xf32>
    %74 = arith.addf %68, %73 : vector<256x4xf32>
    %75 = vector.shape_cast %1 : vector<16x16x4xf32> to vector<256x4xf32>
    %c0_68 = arith.constant 0 : index
    %c0_69 = arith.constant 0 : index
    %76 = vector.load %arg6[%c0_68, %c0_69] : memref<1x4xf32, #tpu.memory_space<vmem>>, vector<1x4xf32>
    %77 = vector.broadcast %76 : vector<1x4xf32> to vector<256x4xf32>
    %78 = arith.mulf %74, %77 : vector<256x4xf32>
    %c0_70 = arith.constant 0 : index
    %c0_71 = arith.constant 0 : index
    %79 = vector.load %arg7[%c0_70, %c0_71] : memref<1x4xf32, #tpu.memory_space<vmem>>, vector<1x4xf32>
    %80 = vector.broadcast %79 : vector<1x4xf32> to vector<256x4xf32>
    %81 = arith.addf %78, %80 : vector<256x4xf32>
    %82 = arith.addf %81, %75 : vector<256x4xf32>
    %cst_72 = arith.constant 0.000000e+00 : f32
    %83 = vector.broadcast %cst_72 : f32 to vector<256x4xf32>
    %84 = arith.maximumf %82, %83 : vector<256x4xf32>
    %85 = vector.shape_cast %84 : vector<256x4xf32> to vector<16x16x4xf32>
    %c0_73 = arith.constant 0 : index
    %c0_74 = arith.constant 0 : index
    %c0_75 = arith.constant 0 : index
    %c0_76 = arith.constant 0 : index
    %86 = vector.load %arg8[%c0_73, %c0_74, %c0_75, %c0_76] : memref<1x16x16x4xf32, #tpu.memory_space<vmem>>, vector<1x16x16x4xf32>
    %87 = vector.shape_cast %86 : vector<1x16x16x4xf32> to vector<16x16x4xf32>
    %88 = vector.shape_cast %85 : vector<16x16x4xf32> to vector<1x16x16x4xf32>
    tpu.vector_store %arg8[%c0_73, %c0_74, %c0_75, %c0_76], %88 {strides = array<i32>} : memref<1x16x16x4xf32, #tpu.memory_space<vmem>>, vector<1x16x16x4xf32>,
    return
  }
  func.func @transform_0(%arg0: i32) -> (i32, i32, i32, i32) {
    %c0_i32 = arith.constant 0 : i32
    %c0_i32_0 = arith.constant 0 : i32
    %c0_i32_1 = arith.constant 0 : i32
    %c0_i32_2 = arith.constant 0 : i32
    return %arg0, %c0_i32, %c0_i32_0, %c0_i32_1 : i32, i32, i32, i32
  }
  func.func @transform_1(%arg0: i32) -> (i32, i32, i32) {
    %c0_i32 = arith.constant 0 : i32
    %c0_i32_0 = arith.constant 0 : i32
    %c0_i32_1 = arith.constant 0 : i32
    %c0_i32_2 = arith.constant 0 : i32
    return %c0_i32, %c0_i32_0, %c0_i32_1 : i32, i32, i32
  }
  func.func @transform_2(%arg0: i32) -> (i32, i32) {
    %c0_i32 = arith.constant 0 : i32
    %c0_i32_0 = arith.constant 0 : i32
    %c0_i32_1 = arith.constant 0 : i32
    return %c0_i32, %c0_i32_0 : i32, i32
  }
  func.func @transform_3(%arg0: i32) -> (i32, i32) {
    %c0_i32 = arith.constant 0 : i32
    %c0_i32_0 = arith.constant 0 : i32
    %c0_i32_1 = arith.constant 0 : i32
    return %c0_i32, %c0_i32_0 : i32, i32
  }
  func.func @transform_4(%arg0: i32) -> (i32, i32, i32) {
    %c0_i32 = arith.constant 0 : i32
    %c0_i32_0 = arith.constant 0 : i32
    %c0_i32_1 = arith.constant 0 : i32
    %c0_i32_2 = arith.constant 0 : i32
    return %c0_i32, %c0_i32_0, %c0_i32_1 : i32, i32, i32
  }
  func.func @transform_5(%arg0: i32) -> (i32, i32) {
    %c0_i32 = arith.constant 0 : i32
    %c0_i32_0 = arith.constant 0 : i32
    %c0_i32_1 = arith.constant 0 : i32
    return %c0_i32, %c0_i32_0 : i32, i32
  }
  func.func @transform_6(%arg0: i32) -> (i32, i32) {
    %c0_i32 = arith.constant 0 : i32
    %c0_i32_0 = arith.constant 0 : i32
    %c0_i32_1 = arith.constant 0 : i32
    return %c0_i32, %c0_i32_0 : i32, i32
  }
  func.func @transform_7(%arg0: i32) -> (i32, i32, i32, i32) {
    %c0_i32 = arith.constant 0 : i32
    %c0_i32_0 = arith.constant 0 : i32
    %c0_i32_1 = arith.constant 0 : i32
    %c0_i32_2 = arith.constant 0 : i32
    return %arg0, %c0_i32, %c0_i32_0, %c0_i32_1 : i32, i32, i32, i32
  }
}

</mosaic_0001>

<bundles_post_ra>
// kernel: basic_block_forward_nhwc.1
= control target key start
LH: loop header
LB: loop body
LE: loop exit
PB: predicated region body
PF: predicated region fallthrough
CT: control target
= control target key end

     0   :  { %s3680_s24 = smov 0   ;;  %s4722_s0 = inlined_call_operand.vmem [shape: f32[2,16,16,4], index: 0, kind: input, shape index: {}]   ;;  %s4723_s1 = inlined_call_operand.vmem [shape: bf16[3,12,4], index: 1, kind: input, shape index: {}]   ;;  %s4724_s2 = inlined_call_operand.vmem [shape: f32[1,4], index: 2, kind: input, shape index: {}]   ;;  %s4725_s3 = inlined_call_operand.vmem [shape: f32[1,4], index: 3, kind: input, shape index: {}]   ;;  %s4726_s4 = inlined_call_operand.vmem [shape: bf16[3,12,4], index: 4, kind: input, shape index: {}]   ;;  %s4727_s5 = inlined_call_operand.vmem [shape: f32[1,4], index: 5, kind: input, shape index: {}]   ;;  %s4728_s6 = inlined_call_operand.vmem [shape: f32[1,4], index: 6, kind: input, shape index: {}]   ;;  %s4729_s7 = inlined_call_operand.vmem [shape: f32[2,16,16,4], index: 7, kind: output, shape index: {}]  }
   0x1 LB: > { %s3013_s25 = sadd.s32 4294967295, %s3635_s24   ;;  %p3017_p0 = scmp.ge.s32.totalorder %s3635_s24, 1  ;;  %s3635_s24 = sphi %s3680_s24, %s17_s24  }
   0x2   : > { %p237_p1 = scmp.lt.s32.totalorder %s3635_s24, 3 }
   0x4   : > { %p238_p2 = pnand %p3017_p0, %p237_p1 }
   0x5   : > { %p269_p3 = scmp.lt.s32.totalorder (!%p238_p2), %s3013_s25, 1  ;;  %vm523_vm0 = vcmask (!%p238_p2), 1047552   ;;  %s3637_s30 = smov (!%p238_p2), 4   ;;  %vm524_vm1 = vsmask.f32 (!%p238_p2), 7424  ;;  %vm847_vm3 = vcmask (!%p238_p2), 1045504  }
   0x6   : > { %241 = sbr.rel (%p238_p2) target bundleno = 1045 (0x415), region = 48  ;;  %vm3729_vm2 = vmand (!%p238_p2), %vm523_vm0, %vm524_vm1  ;;  %s3638_s8 = smov (!%p238_p2), 8   ;;  %vm542_vm4 = vcmask (!%p238_p2), 97280   ;;  %vm456_vm5 = vcmask (!%p238_p2), 1040384   ;;  %vm457_vm6 = vsmask.f32 (!%p238_p2), 256 }
   0x7   : > { %vm3948_vm7 = vmand (!%p238_p2), %vm456_vm5, %vm457_vm6  ;;  %vm642_vm8 = vcmask (!%p238_p2), 31744   ;;  %vm691_vm9 = vcmask (!%p238_p2), 64512  }
   0xd   : > { %s4735_s25 = smov (!%p269_p3, %s3013_s25), 1 }
   0xe   : > { %s3138_s26 = sshll.u32 %s4735_s25, 8 }
   0xf   : > { %s3696_s29 = scalar_lea.vmem %s4722_s0, %s3138_s26  ;;  %s4565_s12 = scalar_lea.vmem %s4729_s7, %s3138_s26 }
  0x10   : > { %v280_v0 = vld [vmem:[%s3696_s29] sm:$0xff]  ;;  %v281_v1 = vld [vmem:[%s3696_s29 + $0x8] sm:$0xff]  ;;  %v282_v2 = vld [vmem:[%s3696_s29 + $0x10] sm:$0xff] }
  0x11   : > { %v3701_v3 = vpack.c.bf16 %v281_v1, %v280_v0  ;;  %v283_v4 = vld [vmem:[%s3696_s29 + $0x18] sm:$0xff]  ;;  %v284_v5 = vld [vmem:[%s3696_s29 + $0x20] sm:$0xff]  ;;  %v285_v6 = vld [vmem:[%s3696_s29 + $0x28] sm:$0xff] }
  0x12   : > { %v3706_v7 = vpack.c.bf16 %v283_v4, %v282_v2  ;;  %v3708_v8 = vpack.c.bf16 %v285_v6, %v284_v5  ;;  %v286_v9 = vld [vmem:[%s3696_s29 + $0x30] sm:$0xff]  ;;  %v287_v10 = vld [vmem:[%s3696_s29 + $0x38] sm:$0xff]  ;;  %v288_v11 = vld [vmem:[%s3696_s29 + $0x40] sm:$0xff] }
  0x13   : > { %562 = vrot.lane.b32.xlu0 %v3701_v3, %s3637_s30  ;;  %v329_v12 = vshrl.u32 %v3701_v3, 16  ;;  %v332_v13 = vshll.u32 %v3701_v3, 16  ;;  %v3717_v14 = vpack.c.bf16 %v287_v10, %v286_v9  ;;  %v289_v15 = vld [vmem:[%s3696_s29 + $0x48] sm:$0xff]  ;;  %v290_v27 = vld [vmem:[%s3696_s29 + $0x50] sm:$0xff]  ;;  %v291_v31 = vld [vmem:[%s3696_s29 + $0x58] sm:$0xff] }
  0x14   : > { %v336_v16 = vshrl.u32 %v3706_v7, 16  ;;  %v339_v17 = vshll.u32 %v3706_v7, 16  ;;  %v343_v18 = vshrl.u32 %v3708_v8, 16  ;;  %v346_v19 = vshll.u32 %v3708_v8, 16  ;;  %v292_v32 = vld [vmem:[%s3696_s29 + $0x60] sm:$0xff]  ;;  %v293_v33 = vld [vmem:[%s3696_s29 + $0x68] sm:$0xff] }
  0x15   : > { %v475_v20 = vrot.slane %v332_v13, 1  ;;  %v3726_v21 = vpack.c.bf16 %v289_v15, %v288_v11  ;;  %v353_v26 = vshll.u32 %v3717_v14, 16  ;;  %v350_v35 = vshrl.u32 %v3717_v14, 16  ;;  %v294_v43 = vld [vmem:[%s3696_s29 + $0x70] sm:$0xff]  ;;  %v295_v44 = vld [vmem:[%s3696_s29 + $0x78] sm:$0xff]  ;;  %v296_v50 = vld [vmem:[%s3696_s29 + $0x80] sm:$0xff] }
  0x16   : > { %v477_v23 = vrot.slane %v339_v17, 1  ;;  %v479_v24 = vrot.slane %v346_v19, 1  ;;  %v3755_v38 = vpack.c.bf16 %v291_v31, %v290_v27  ;;  %v3757_v39 = vpack.c.bf16 %v293_v33, %v292_v32  ;;  %v297_v51 = vld [vmem:[%s3696_s29 + $0x88] sm:$0xff]  ;;  %v298_v0 = vld [vmem:[%s3696_s29 + $0x90] sm:$0xff]  ;;  %v299_v1 = vld [vmem:[%s3696_s29 + $0x98] sm:$0xff] }
  0x17   : > { %564 = vrot.lane.b32.xlu0 %v3706_v7, %s3637_s30  ;;  %v476_v25 = vor.u32 %v475_v20, %v329_v12  ;;  %v360_v30 = vshll.u32 %v3726_v21, 16  ;;  %v481_v37 = vrot.slane %v353_v26, 1  ;;  %v357_v41 = vshrl.u32 %v3726_v21, 16  ;;  %v300_v9 = vld [vmem:[%s3696_s29 + $0xa0] sm:$0xff]  ;;  %v301_v10 = vld [vmem:[%s3696_s29 + $0xa8] sm:$0xff]  ;;  %v302_v20 = vld [vmem:[%s3696_s29 + $0xb0] sm:$0xff] }
  0x18   : > { %v478_v28 = vor.u32 %v477_v23, %v336_v16  ;;  %v480_v29 = vor.u32 %v479_v24, %v343_v18  ;;  %v367_v46 = vshll.u32 %v3755_v38, 16  ;;  %v374_v47 = vshll.u32 %v3757_v39, 16  ;;  %v303_v23 = vld [vmem:[%s3696_s29 + $0xb8] sm:$0xff]  ;;  %v304_v27 = vld [vmem:[%s3696_s29 + $0xc0] sm:$0xff] }
  0x19   : > { %v526_v34 = vsel %vm3729_vm2, %v476_v25, 0  ;;  %v483_v42 = vrot.slane %v360_v30, 1  ;;  %v482_v45 = vor.u32 %v481_v37, %v350_v35  ;;  %v3770_v49 = vpack.c.bf16 %v295_v44, %v294_v43  ;;  %v3848_v7 = vld [vmem:[%s4723_s1] sm:$0x3f]  }
  0x1a   : > { %610 = vrot.lane.b32.xlu1 %v526_v34, %s3638_s8  ;;  %v527_v36 = vsel %vm3729_vm2, %v478_v28, 0  ;;  %v528_v40 = vsel %vm3729_vm2, %v480_v29, 0  ;;  %v364_v52 = vshrl.u32 %v3755_v38, 16  ;;  %v485_v54 = vrot.slane %v367_v46, 1  ;;  %v305_v28 = vld [vmem:[%s3696_s29 + $0xc8] sm:$0xff] }
  0x1b   : > { %566 = vrot.lane.b32.xlu0 %v3708_v8, %s3637_s30  ;;  %v484_v48 = vor.u32 %v483_v42, %v357_v41  ;;  %v529_v53 = vsel %vm3729_vm2, %v482_v45, 0  ;;  %v371_v55 = vshrl.u32 %v3757_v39, 16  ;;  %v487_v56 = vrot.slane %v374_v47, 1 }
  0x1c   : > { %v3788_v58 = vpack.c.bf16 %v297_v51, %v296_v50  ;;  %v381_v59 = vshll.u32 %v3770_v49, 16  ;;  %v331_v60 = vrot.slane %v329_v12, 7  ;;  %v338_v61 = vrot.slane %v336_v16, 7  ;;  %v306_v51 = vld [vmem:[%s3696_s29 + $0xd0] sm:$0xff] }
  0x1d   : > { %v530_v57 = vsel %vm3729_vm2, %v484_v48, 0  ;;  %v486_v62 = vor.u32 %v485_v54, %v364_v52  ;;  %v488_v63 = vor.u32 %v487_v56, %v371_v55  ;;  %v345_v2 = vrot.slane %v343_v18, 7 }
  0x1e   : > { %612 = vrot.lane.b32.xlu1 %v527_v36, %s3638_s8  ;;  %v378_v4 = vshrl.u32 %v3770_v49, 16  ;;  %v489_v5 = vrot.slane %v381_v59, 1  ;;  %v388_v6 = vshll.u32 %v3788_v58, 16  ;;  %v352_v11 = vrot.slane %v350_v35, 7  ;;  %v3591_v35 = vld [vmem:[%s4723_s1 + $0x8] sm:$0x3f]  }
  0x1f   : > { %614 = vrot.lane.b32.xlu0 %v528_v40, %s3638_s8  ;;  %v359_v12 = vrot.slane %v357_v41, 7  ;;  %v366_v15 = vrot.slane %v364_v52, 7  ;;  %v385_v16 = vshrl.u32 %v3788_v58, 16  ;;  %v373_v18 = vrot.slane %v371_v55, 7  ;;  %3574 = vmatprep.subr.msk.bf16.mxu0 %vm847_vm3, %v3591_v35 }
  0x20   : > { %v380_v24 = vrot.slane %v378_v4, 7  ;;  %v3806_v25 = vpack.c.bf16 %v299_v1, %v298_v0  ;;  %v3812_v29 = vor.u32 %v332_v13, %v331_v60  ;;  %v531_v31 = vsel %vm3729_vm2, %v486_v62, 0  ;;  %v309_v62 = vld [vmem:[%s3696_s29 + $0xe8] sm:$0xff] }
  0x21   : > { %v532_v32 = vsel %vm3729_vm2, %v488_v63, 0  ;;  %v387_v33 = vrot.slane %v385_v16, 7  ;;  %v3820_v34 = vpack.c.bf16 %v301_v10, %v300_v9  ;;  %v490_v36 = vor.u32 %v489_v5, %v378_v4  ;;  %v310_v10 = vld [vmem:[%s3696_s29 + $0xf0] sm:$0xff] }
  0x22   : > { %568 = vrot.lane.b32.xlu1 %v3717_v14, %s3637_s30  ;;  %v491_v3 = vrot.slane %v388_v6, 1  ;;  %v392_v13 = vshrl.u32 %v3806_v25, 16  ;;  %v3826_v37 = vpack.c.bf16 %v303_v23, %v302_v20  ;;  %v3829_v41 = vpack.c.bf16 %v305_v28, %v304_v27  ;;  %v307_v14 = vld [vmem:[%s3696_s29 + $0xd8] sm:$0xff] }
  0x23   : > { %570 = vrot.lane.b32.xlu0 %v3726_v21, %s3637_s30  ;;  %v399_v40 = vshrl.u32 %v3820_v34, 16  ;;  %v3833_v42 = vor.u32 %v339_v17, %v338_v61  ;;  %v3837_v43 = vor.u32 %v346_v19, %v345_v2  ;;  %v3843_v48 = vor.u32 %v353_v26, %v352_v11  ;;  %v308_v61 = vld [vmem:[%s3696_s29 + $0xe0] sm:$0xff]  ;;  %v311_v11 = vld [vmem:[%s3696_s29 + $0xf8] sm:$0xff] }
  0x24   : > { %v394_v44 = vrot.slane %v392_v13, 7  ;;  %v406_v45 = vshrl.u32 %v3826_v37, 16  ;;  %v395_v8 = vshll.u32 %v3806_v25, 16  ;;  %v402_v19 = vshll.u32 %v3820_v34, 16 }
  0x25   : > { %v401_v17 = vrot.slane %v399_v40, 7  ;;  %v413_v50 = vshrl.u32 %v3829_v41, 16  ;;  %v492_v26 = vor.u32 %v491_v3, %v385_v16  ;;  %v3862_v54 = vor.u32 %v360_v30, %v359_v12 }
  0x26   : > { %616 = vrot.lane.b32.xlu1 %v529_v53, %s3638_s8  ;;  %v408_v52 = vrot.slane %v406_v45, 7  ;;  %v849_v53 = vsel %vm847_vm3, %v3591_v35, 0  ;;  %v3866_v56 = vor.u32 %v367_v46, %v366_v15  ;;  %v3874_v60 = vor.u32 %v381_v59, %v380_v24 }
  0x27   : > { %618 = vrot.lane.b32.xlu0 %v530_v57, %s3638_s8  ;;  %v415_v55 = vrot.slane %v413_v50, 7  ;;  %3243 = vmatpush3.bf16.msra.mxu0 %v849_v53  ;;  %v3870_v57 = vor.u32 %v374_v47, %v373_v18  ;;  %v409_v21 = vshll.u32 %v3826_v37, 16  ;;  %v325_v30 = vpack.c.bf16 %v307_v14, %v306_v51 }
  0x28   : > { %3575 = vmatprep.subr.msk.bf16.mxu0 %vm847_vm3, %v3848_v7  ;;  %v533_v46 = vsel %vm3729_vm2, %v490_v36, 0  ;;  %v493_v47 = vrot.slane %v395_v8, 1  ;;  %v3892_v59 = vor.u32 %v402_v19, %v401_v17  ;;  %v534_v63 = vsel %vm3729_vm2, %v492_v26, 0 }
  0x29   : > { %v495_v0 = vrot.slane %v402_v19, 1  ;;  %v420_v1 = vshrl.u32 %v325_v30, 16  ;;  %v3896_v2 = vor.u32 %v409_v21, %v408_v52  ;;  %v326_v4 = vpack.c.bf16 %v309_v62, %v308_v61 }
  0x2a   : > { %572 = vrot.lane.b32.xlu1 %v3755_v38, %s3637_s30  ;;  %v3883_v38 = vor.u32 %v388_v6, %v387_v33  ;;  %v494_v6 = vor.u32 %v493_v47, %v392_v13  ;;  %v423_v15 = vshll.u32 %v325_v30, 16  ;;  %v327_v20 = vpack.c.bf16 %v311_v11, %v310_v10 }
  0x2b   : > { %574 = vrot.lane.b32.xlu0 %v3757_v39, %s3637_s30  ;;  %v3885_v39 = vor.u32 %v395_v8, %v394_v44  ;;  %v427_v9 = vshrl.u32 %v326_v4, 16  ;;  %v496_v12 = vor.u32 %v495_v0, %v399_v40  ;;  %v497_v24 = vrot.slane %v409_v21, 1 }
  0x2c   : > { %v535_v18 = vsel %vm3729_vm2, %v494_v6, 0  ;;  %v430_v27 = vshll.u32 %v326_v4, 16  ;;  %v437_v36 = vshll.u32 %v327_v20, 16  ;;  %v501_v40 = vrot.slane %v423_v15, 1 }
  0x2d   : > { %v429_v16 = vrot.slane %v427_v9, 7  ;;  %v536_v28 = vsel %vm3729_vm2, %v496_v12, 0  ;;  %v3639_v51 = vmov 0   ;;  %v459_v53 = vsel %vm3948_vm7, 0, %v3812_v29 }
  0x2e   : > { %620 = vrot.lane.b32.xlu1 %v531_v31, %s3638_s8  ;;  %v503_v8 = vrot.slane %v430_v27, 1  ;;  %543 = vst.msk [vmem:[#allocation2] sm:$0xff] %vm542_vm4, %v3639_v51  ;;  %545 = vst.msk [vmem:[#allocation2 + $0x88] sm:$0xff] %vm542_vm4, %v3639_v51  ;;  %v461_v62 = vsel %vm3948_vm7, 0, %v3837_v43 }
  0x2f   : > { %622 = vrot.lane.b32.xlu0 %v532_v32, %s3638_s8  ;;  %v434_v32 = vshrl.u32 %v327_v20, 16  ;;  %v3914_v33 = vor.u32 %v430_v27, %v429_v16  ;;  %1832 = vst.msk [vmem:[#allocation3] sm:$0xff] %vm542_vm4, %v3639_v51  ;;  %1834 = vst.msk [vmem:[#allocation3 + $0x88] sm:$0xff] %vm542_vm4, %v3639_v51  ;;  %v465_v27 = vsel %vm3948_vm7, 0, %v3870_v57 }
  0x30   : > { %v504_v17 = vor.u32 %v503_v8, %v427_v9  ;;  %v466_v8 = vsel %vm3948_vm7, 0, %v3874_v60 }
  0x32   : > { %576 = vrot.lane.b32.xlu1 %v3770_v49, %s3637_s30  ;;  %v416_v49 = vshll.u32 %v3829_v41, 16  ;;  %v540_v19 = vsel %vm3729_vm2, %v504_v17, 0 }
  0x33   : > { %578 = vrot.lane.b32.xlu0 %v3788_v58, %s3637_s30  ;;  %v422_v58 = vrot.slane %v420_v1, 7 }
  0x34   : > { %v3898_v5 = vor.u32 %v416_v49, %v415_v55  ;;  %v499_v31 = vrot.slane %v416_v49, 1 }
  0x35   : > { %v3906_v23 = vor.u32 %v423_v15, %v422_v58  ;;  %v462_v58 = vsel %vm3948_vm7, 0, %v3843_v48  ;;  %v1066_v15 = vsel %vm847_vm3, %v3848_v7, 0 }
  0x36   : > { %624 = vrot.lane.b32.xlu1 %v533_v46, %s3638_s8  ;;  %v500_v35 = vor.u32 %v499_v31, %v413_v50 }
  0x37   : > { %626 = vrot.lane.b32.xlu0 %v534_v63, %s3638_s8 }
  0x38   : > { %v538_v44 = vsel %vm3729_vm2, %v500_v35, 0 }
  0x3a   : > { %580 = vrot.lane.b32.xlu1 %v3806_v25, %s3637_s30  ;;  %v436_v25 = vrot.slane %v434_v32, 7 }
  0x3b   : > { %582 = vrot.lane.b32.xlu0 %v3820_v34, %s3637_s30  ;;  %v498_v34 = vor.u32 %v497_v24, %v406_v45  ;;  %v502_v45 = vor.u32 %v501_v40, %v420_v1 }
  0x3c   : > { %v3922_v3 = vor.u32 %v437_v36, %v436_v25 }
  0x3d   : > { %v537_v13 = vsel %vm3729_vm2, %v498_v34, 0 }
  0x3e   : > { %628 = vrot.lane.b32.xlu1 %v535_v18, %s3638_s8 }
  0x3f   : > { %630 = vrot.lane.b32.xlu0 %v536_v28, %s3638_s8  ;;  %v464_v28 = vsel %vm3948_vm7, 0, %v3866_v56 }
  0x42   : > { %584 = vrot.lane.b32.xlu1 %v3826_v37, %s3637_s30  ;;  %v539_v37 = vsel %vm3729_vm2, %v502_v45, 0 }
  0x43   : > { %586 = vrot.lane.b32.xlu0 %v3829_v41, %s3637_s30  ;;  %v505_v41 = vrot.slane %v437_v36, 1 }
  0x45   : > { %v506_v50 = vor.u32 %v505_v41, %v434_v32 }
  0x46   : > { %632 = vrot.lane.b32.xlu1 %v537_v13, %s3638_s8 }
  0x47   : > { %634 = vrot.lane.b32.xlu0 %v538_v44, %s3638_s8  ;;  %v541_v14 = vsel %vm3729_vm2, %v506_v50, 0  ;;  %v467_v44 = vsel %vm3948_vm7, 0, %v3883_v38 }
  0x4a   : > { %588 = vrot.lane.b32.xlu1 %v325_v30, %s3637_s30  ;;  %v460_v30 = vsel %vm3948_vm7, 0, %v3833_v42 }
  0x4b   : > { %590 = vrot.lane.b32.xlu0 %v326_v4, %s3637_s30  ;;  %v463_v4 = vsel %vm3948_vm7, 0, %v3862_v54  ;;  %v3987_v54 = vld [vmem:[%s4723_s1 + $0x10] sm:$0x3f]  }
  0x4e   : > { %636 = vrot.lane.b32.xlu1 %v539_v37, %s3638_s8 }
  0x4f   : > { %638 = vrot.lane.b32.xlu0 %v540_v19, %s3638_s8 }
  0x52   : > { %592 = vrot.lane.b32.xlu1 %v327_v20, %s3637_s30 }
  0x56   : > { %640 = vrot.lane.b32.xlu1 %v541_v14, %s3638_s8 }
  0x85   : > { %v563_v52 = vpop.permute.xlu0 %562 }
  0x86   : > { %v645_v21 = vsel %vm642_vm8, %v459_v53, %v563_v52  ;;  %v469_v52 = vsel %vm3948_vm7, 0, %v3892_v59  ;;  %v468_v53 = vsel %vm3948_vm7, 0, %v3885_v39 }
  0x89   : > { %v565_v55 = vpop.permute.xlu0 %564 }
  0x8a   : > { %v648_v49 = vsel %vm642_vm8, %v460_v30, %v565_v55 }
  0x8c   : > { %v611_v61 = vpop.permute.xlu1 %610 }
  0x8d   : > { %v693_v46 = vsel %vm691_vm9, %v645_v21, %v611_v61  ;;  %v567_v47 = vpop.permute.xlu0 %566 }
  0x8e   : > { %741 = vst.msk [vmem:[#allocation2 + $0x8] sm:$0xff] %vm542_vm4, %v693_v46  ;;  %v651_v29 = vsel %vm642_vm8, %v461_v62, %v567_v47 }
  0x90   : > { %v613_v63 = vpop.permute.xlu1 %612 }
  0x91   : > { %v696_v0 = vsel %vm691_vm9, %v648_v49, %v613_v63  ;;  %v615_v1 = vpop.permute.xlu0 %614  ;;  %v470_v63 = vsel %vm3948_vm7, 0, %v3896_v2 }
  0x92   : > { %742 = vst.msk [vmem:[#allocation2 + $0x10] sm:$0xff] %vm542_vm4, %v696_v0  ;;  %v699_v42 = vsel %vm691_vm9, %v651_v29, %v615_v1  ;;  %v471_v29 = vsel %vm3948_vm7, 0, %v3898_v5 }
  0x93   : > { %743 = vst.msk [vmem:[#allocation2 + $0x18] sm:$0xff] %vm542_vm4, %v699_v42 }
  0x94   : > { %v569_v43 = vpop.permute.xlu1 %568 }
  0x95   : > { %v3976_v6 = vld [vmem:[#allocation2 + $0x8] sm:$0xff]  ;;  %v571_v9 = vpop.permute.xlu0 %570  ;;  %v654_v11 = vsel %vm642_vm8, %v462_v58, %v569_v43 }
  0x96   : > { %3244 = vmatprep.mubr.msk.bf16.mxu0 %vm542_vm4, %v3976_v6  ;;  %v657_v10 = vsel %vm642_vm8, %v463_v4, %v571_v9 }
  0x98   : > { %v617_v12 = vpop.permute.xlu1 %616 }
  0x99   : > { %v702_v48 = vsel %vm691_vm9, %v654_v11, %v617_v12  ;;  %v3990_v16 = vld [vmem:[#allocation2 + $0x10] sm:$0xff]  ;;  %v619_v20 = vpop.permute.xlu0 %618  ;;  %v473_v11 = vsel %vm3948_vm7, 0, %v3914_v33  ;;  %v472_v12 = vsel %vm3948_vm7, 0, %v3906_v23 }
  0x9a   : > { %744 = vst.msk [vmem:[#allocation2 + $0x20] sm:$0xff] %vm542_vm4, %v702_v48  ;;  %3245 = vmatmul.mubr.msk.bf16.vlgmr.msra.gmra.mrb[0].mxu0 %vm542_vm4, %v3990_v16  ;;  %v705_v18 = vsel %vm691_vm9, %v657_v10, %v619_v20  ;;  %v3996_v24 = vld [vmem:[#allocation2 + $0x18] sm:$0xff] }
  0x9b   : > { %3277 = vmatpush3.bf16.msra.mxu0 %v1066_v15  ;;  %745 = vst.msk [vmem:[#allocation2 + $0x28] sm:$0xff] %vm542_vm4, %v705_v18  ;;  %3248 = vmatprep.mubr.msk.bf16.mxu0 %vm542_vm4, %v3996_v24 }
  0x9c   : > { %v573_v7 = vpop.permute.xlu1 %572  ;;  %3576 = vmatprep.subr.msk.bf16.mxu0 %vm847_vm3, %v3987_v54 }
  0x9d   : > { %v575_v31 = vpop.permute.xlu0 %574  ;;  %v660_v25 = vsel %vm642_vm8, %v464_v28, %v573_v7 }
  0x9e   : > { %v663_v32 = vsel %vm642_vm8, %v465_v27, %v575_v31 }
  0xa0   : > { %v621_v34 = vpop.permute.xlu1 %620 }
  0xa1   : > { %v708_v35 = vsel %vm691_vm9, %v660_v25, %v621_v34  ;;  %v4012_v36 = vld [vmem:[#allocation2 + $0x20] sm:$0xff]  ;;  %v623_v13 = vpop.permute.xlu0 %622 }
  0xa2   : > { %746 = vst.msk [vmem:[#allocation2 + $0x30] sm:$0xff] %vm542_vm4, %v708_v35  ;;  %3249 = vmatmul.mubr.msk.bf16.gmra.mrb[4].mxu0 %vm542_vm4, %v4012_v36  ;;  %v711_v57 = vsel %vm691_vm9, %v663_v32, %v623_v13  ;;  %v4018_v40 = vld [vmem:[#allocation2 + $0x28] sm:$0xff]  ;;  %v474_v32 = vsel %vm3948_vm7, 0, %v3922_v3  ;;  %v1303_v3 = vsel %vm847_vm3, %v3987_v54, 0  ;;  %v4159_v54 = vld [vmem:[%s4724_s2] ss:$0 sm:$0xff] }
  0xa3   : > { %747 = vst.msk [vmem:[#allocation2 + $0x38] sm:$0xff] %vm542_vm4, %v711_v57  ;;  %3252 = vmatprep.mubr.msk.bf16.mxu0 %vm542_vm4, %v4018_v40 }
  0xa4   : > { %v577_v56 = vpop.permute.xlu1 %576 }
  0xa5   : > { %v579_v45 = vpop.permute.xlu0 %578  ;;  %v666_v37 = vsel %vm642_vm8, %v466_v8, %v577_v56  ;;  %v757_v56 = vld [vmem:[#allocation2] sm:$0xff] }
  0xa6   : > { %v669_v17 = vsel %vm642_vm8, %v467_v44, %v579_v45 }
  0xa8   : > { %v625_v41 = vpop.permute.xlu1 %624 }
  0xa9   : > { %v714_v19 = vsel %vm691_vm9, %v666_v37, %v625_v41  ;;  %v4032_v50 = vld [vmem:[#allocation2 + $0x30] sm:$0xff]  ;;  %v627_v51 = vpop.permute.xlu0 %626 }
  0xaa   : > { %748 = vst.msk [vmem:[#allocation2 + $0x40] sm:$0xff] %vm542_vm4, %v714_v19  ;;  %3253 = vmatmul.mubr.msk.bf16.gmra.mrb[8].mxu0 %vm542_vm4, %v4032_v50  ;;  %v717_v38 = vsel %vm691_vm9, %v669_v17, %v627_v51  ;;  %v4038_v14 = vld [vmem:[#allocation2 + $0x38] sm:$0xff] }
  0xab   : > { %749 = vst.msk [vmem:[#allocation2 + $0x48] sm:$0xff] %vm542_vm4, %v717_v38  ;;  %3256 = vmatprep.mubr.msk.bf16.mxu0 %vm542_vm4, %v4038_v14 }
  0xac   : > { %v581_v60 = vpop.permute.xlu1 %580 }
  0xad   : > { %v583_v55 = vpop.permute.xlu0 %582  ;;  %v672_v30 = vsel %vm642_vm8, %v468_v53, %v581_v60 }
  0xae   : > { %v675_v21 = vsel %vm642_vm8, %v469_v52, %v583_v55 }
  0xb0   : > { %v629_v61 = vpop.permute.xlu1 %628 }
  0xb1   : > { %v720_v62 = vsel %vm691_vm9, %v672_v30, %v629_v61  ;;  %v4052_v46 = vld [vmem:[#allocation2 + $0x40] sm:$0xff]  ;;  %v631_v47 = vpop.permute.xlu0 %630 }
  0xb2   : > { %750 = vst.msk [vmem:[#allocation2 + $0x50] sm:$0xff] %vm542_vm4, %v720_v62  ;;  %3257 = vmatmul.mubr.msk.bf16.gmra.mrb[12].mxu0 %vm542_vm4, %v4052_v46  ;;  %v723_v59 = vsel %vm691_vm9, %v675_v21, %v631_v47  ;;  %v4058_v49 = vld [vmem:[#allocation2 + $0x48] sm:$0xff] }
  0xb3   : > { %751 = vst.msk [vmem:[#allocation2 + $0x58] sm:$0xff] %vm542_vm4, %v723_v59  ;;  %3260 = vmatprep.mubr.msk.bf16.mxu0 %vm542_vm4, %v4058_v49  ;;  %v3594_v59 = vld [vmem:[%s4726_s4 + $0x8] sm:$0x3f]  }
  0xb4   : > { %v585_v39 = vpop.permute.xlu1 %584  ;;  %3577 = vmatprep.subr.msk.bf16.mxu1 %vm847_vm3, %v3594_v59 }
  0xb5   : > { %v587_v0 = vpop.permute.xlu0 %586  ;;  %v678_v42 = vsel %vm642_vm8, %v470_v63, %v585_v39 }
  0xb6   : > { %v681_v1 = vsel %vm642_vm8, %v471_v29, %v587_v0 }
  0xb8   : > { %v633_v43 = vpop.permute.xlu1 %632 }
  0xb9   : > { %v726_v4 = vsel %vm691_vm9, %v678_v42, %v633_v43  ;;  %v4072_v58 = vld [vmem:[#allocation2 + $0x50] sm:$0xff]  ;;  %v635_v9 = vpop.permute.xlu0 %634 }
  0xba   : > { %752 = vst.msk [vmem:[#allocation2 + $0x60] sm:$0xff] %vm542_vm4, %v726_v4  ;;  %3261 = vmatmul.mubr.msk.bf16.gmra.mrb[16].mxu0 %vm542_vm4, %v4072_v58  ;;  %v729_v5 = vsel %vm691_vm9, %v681_v1, %v635_v9  ;;  %v785_v10 = vld [vmem:[#allocation2 + $0x58] sm:$0xff] }
  0xbb   : > { %753 = vst.msk [vmem:[#allocation2 + $0x68] sm:$0xff] %vm542_vm4, %v729_v5  ;;  %3264 = vmatprep.mubr.msk.bf16.mxu0 %vm542_vm4, %v785_v10 }
  0xbc   : > { %v589_v2 = vpop.permute.xlu1 %588 }
  0xbd   : > { %v591_v15 = vpop.permute.xlu0 %590  ;;  %v684_v20 = vsel %vm642_vm8, %v472_v12, %v589_v2 }
  0xbe   : > { %v687_v48 = vsel %vm642_vm8, %v473_v11, %v591_v15 }
  0xc0   : > { %v637_v18 = vpop.permute.xlu1 %636 }
  0xc1   : > { %v732_v7 = vsel %vm691_vm9, %v684_v20, %v637_v18  ;;  %v786_v27 = vld [vmem:[#allocation2 + $0x60] sm:$0xff]  ;;  %v639_v28 = vpop.permute.xlu0 %638  ;;  %v2135_v18 = vsel %vm847_vm3, %v3594_v59, 0 }
  0xc2   : > { %754 = vst.msk [vmem:[#allocation2 + $0x70] sm:$0xff] %vm542_vm4, %v732_v7  ;;  %3265 = vmatmul.mubr.msk.bf16.gmra.mrb[20].mxu0 %vm542_vm4, %v786_v27  ;;  %v735_v33 = vsel %vm691_vm9, %v687_v48, %v639_v28  ;;  %v787_v31 = vld [vmem:[#allocation2 + $0x68] sm:$0xff]  ;;  %v4194_v7 = vld [vmem:[%s4726_s4] sm:$0x3f]   ;;  %3345 = vmatpush3.bf16.msra.mxu1 %v2135_v18 }
  0xc3   : > { %755 = vst.msk [vmem:[#allocation2 + $0x78] sm:$0xff] %vm542_vm4, %v735_v33  ;;  %3268 = vmatprep.mubr.msk.bf16.mxu0 %vm542_vm4, %v787_v31  ;;  %3578 = vmatprep.subr.msk.bf16.mxu1 %vm847_vm3, %v4194_v7 }
  0xc4   : > { %v593_v23 = vpop.permute.xlu1 %592 }
  0xc5   : > { %v690_v25 = vsel %vm642_vm8, %v474_v32, %v593_v23 }
  0xc8   : > { %v641_v34 = vpop.permute.xlu1 %640 }
  0xc9   : > { %v738_v35 = vsel %vm691_vm9, %v690_v25, %v641_v34  ;;  %v788_v13 = vld [vmem:[#allocation2 + $0x70] sm:$0xff] }
  0xca   : > { %756 = vst.msk [vmem:[#allocation2 + $0x80] sm:$0xff] %vm542_vm4, %v738_v35  ;;  %3269 = vmatmul.mubr.msk.bf16.gmra.mrb[24].mxu0 %vm542_vm4, %v788_v13  ;;  %v789_v57 = vld [vmem:[#allocation2 + $0x78] sm:$0xff] }
  0xcb   : > { %3272 = vmatprep.mubr.msk.bf16.mxu0 %vm542_vm4, %v789_v57 }
  0xd1   : > { %v790_v44 = vld [vmem:[#allocation2 + $0x80] sm:$0xff] }
  0xd2   : > { %3273 = vmatmul.mubr.msk.bf16.gmra.mrb[28].mxu0 %vm542_vm4, %v790_v44 }
  0xd3   : > { %3278 = vmatprep.mubr.msk.bf16.mxu0 %vm542_vm4, %v757_v56 }
  0xda   : > { %3279 = vmatmul.mubr.msk.bf16.vlgmr.msra.gmra.mrb[0].mxu0 %vm542_vm4, %v3976_v6  ;;  %v1245_v6 = vld [vmem:[#allocation2 + $0x88] sm:$0xff] }
  0xdb   : > { %3311 = vmatpush3.bf16.msra.mxu0 %v1303_v3  ;;  %3282 = vmatprep.mubr.msk.bf16.mxu0 %vm542_vm4, %v3990_v16 }
  0xe2   : > { %3283 = vmatmul.mubr.msk.bf16.gmra.mrb[4].mxu0 %vm542_vm4, %v3996_v24 }
  0xe3   : > { %3286 = vmatprep.mubr.msk.bf16.mxu0 %vm542_vm4, %v4012_v36 }
  0xea   : > { %3287 = vmatmul.mubr.msk.bf16.gmra.mrb[8].mxu0 %vm542_vm4, %v4018_v40 }
  0xeb   : > { %3290 = vmatprep.mubr.msk.bf16.mxu0 %vm542_vm4, %v4032_v50 }
  0xf2   : > { %3291 = vmatmul.mubr.msk.bf16.gmra.mrb[12].mxu0 %vm542_vm4, %v4038_v14 }
  0xf3   : > { %3294 = vmatprep.mubr.msk.bf16.mxu0 %vm542_vm4, %v4052_v46 }
  0xfa   : > { %3295 = vmatmul.mubr.msk.bf16.gmra.mrb[16].mxu0 %vm542_vm4, %v4058_v49 }
  0xfb   : > { %3298 = vmatprep.mubr.msk.bf16.mxu0 %vm542_vm4, %v4072_v58 }
 0x102   : > { %3299 = vmatmul.mubr.msk.bf16.gmra.mrb[20].mxu0 %vm542_vm4, %v785_v10 }
 0x103   : > { %3302 = vmatprep.mubr.msk.bf16.mxu0 %vm542_vm4, %v786_v27 }
 0x10a   : > { %3303 = vmatmul.mubr.msk.bf16.gmra.mrb[24].mxu0 %vm542_vm4, %v787_v31 }
 0x10b   : > { %3306 = vmatprep.mubr.msk.bf16.mxu0 %vm542_vm4, %v788_v13 }
 0x112   : > { %3307 = vmatmul.mubr.msk.bf16.gmra.mrb[28].mxu0 %vm542_vm4, %v789_v57 }
 0x113   : > { %3312 = vmatprep.mubr.msk.bf16.mxu0 %vm542_vm4, %v3990_v16 }
 0x11a   : > { %3313 = vmatmul.mubr.msk.bf16.vlgmr.msra.gmra.mrb[0].mxu0 %vm542_vm4, %v3996_v24  ;;  %v4164_v24 = vld [vmem:[%s4725_s3] ss:$0 sm:$0xff] }
 0x11b   : > { %3316 = vmatprep.mubr.msk.bf16.mxu0 %vm542_vm4, %v4012_v36 }
 0x122   : > { %3317 = vmatmul.mubr.msk.bf16.gmra.mrb[4].mxu0 %vm542_vm4, %v4018_v40 }
 0x123   : > { %3320 = vmatprep.mubr.msk.bf16.mxu0 %vm542_vm4, %v4032_v50 }
 0x12a   : > { %3321 = vmatmul.mubr.msk.bf16.gmra.mrb[8].mxu0 %vm542_vm4, %v4038_v14 }
 0x12b   : > { %3324 = vmatprep.mubr.msk.bf16.mxu0 %vm542_vm4, %v4052_v46 }
 0x132   : > { %3325 = vmatmul.mubr.msk.bf16.gmra.mrb[12].mxu0 %vm542_vm4, %v4058_v49 }
 0x133   : > { %3328 = vmatprep.mubr.msk.bf16.mxu0 %vm542_vm4, %v4072_v58 }
 0x13a   : > { %3329 = vmatmul.mubr.msk.bf16.gmra.mrb[16].mxu0 %vm542_vm4, %v785_v10 }
 0x13b   : > { %3332 = vmatprep.mubr.msk.bf16.mxu0 %vm542_vm4, %v786_v27 }
 0x142   : > { %3333 = vmatmul.mubr.msk.bf16.gmra.mrb[20].mxu0 %vm542_vm4, %v787_v31 }
 0x143   : > { %3336 = vmatprep.mubr.msk.bf16.mxu0 %vm542_vm4, %v788_v13 }
 0x14a   : > { %3337 = vmatmul.mubr.msk.bf16.gmra.mrb[24].mxu0 %vm542_vm4, %v789_v57 }
 0x14b   : > { %3340 = vmatprep.mubr.msk.bf16.mxu0 %vm542_vm4, %v790_v44 }
 0x152   : > { %3341 = vmatmul.mubr.msk.bf16.gmra.mrb[28].mxu0 %vm542_vm4, %v1245_v6 }
 0x1ed   : > { %v3314_v16 = vpop.f32.mrb[0].mxu0 }
 0x1ee   : > { %v1507_v36 = vmul.f32 %v3314_v16, %v4159_v54  ;;  %v1339_v40 = vpop.f32.mrb[1].mxu0 }
 0x1ef   : > { %v1505_v8 = vmul.f32 %v4159_v54, %v1339_v40  ;;  %v3315_v45 = vpop.f32.mrb[2].mxu0 }
 0x1f0   : > { %v1546_v17 = vadd.f32 %v4164_v24, %v1507_v36  ;;  %v1508_v37 = vmul.f32 %v3315_v45, %v4159_v54  ;;  %v1342_v41 = vpop.f32.mrb[3].mxu0 }
 0x1f1   : > { %v1544_v19 = vadd.f32 %v4164_v24, %v1505_v8  ;;  %v1506_v50 = vmul.f32 %v4159_v54, %v1342_v41 }
 0x1f2   : > { %v1547_v51 = vadd.f32 %v4164_v24, %v1508_v37  ;;  %v1578_v14 = vmax.f32 %v1546_v17, 0.0 }
 0x1f3   : > { %v1545_v38 = vadd.f32 %v4164_v24, %v1506_v50  ;;  %v1576_v52 = vmax.f32 %v1544_v19, 0.0 }
 0x1f4   : > { %v1579_v60 = vmax.f32 %v1547_v51, 0.0 }
 0x1f5   : > { %v1577_v53 = vmax.f32 %v1545_v38, 0.0  ;;  %v3318_v55 = vpop.f32.mrb[4].mxu0 }
 0x1f6   : > { %v1511_v21 = vmul.f32 %v3318_v55, %v4159_v54  ;;  %v1355_v30 = vpop.f32.mrb[5].mxu0  ;;  %v1609_v61 = vpack.c.bf16 %v1579_v60, %v1578_v14 }
 0x1f7   : > { %v1509_v62 = vmul.f32 %v4159_v54, %v1355_v30  ;;  %v3319_v46 = vpop.f32.mrb[6].mxu0  ;;  %v1608_v47 = vpack.c.bf16 %v1577_v53, %v1576_v52 }
 0x1f8   : > { %v1550_v49 = vadd.f32 %v4164_v24, %v1511_v21  ;;  %v1512_v39 = vmul.f32 %v3319_v46, %v4159_v54  ;;  %1853 = vrot.lane.b32.xlu1 %v1609_v61, %s3637_s30  ;;  %v1358_v29 = vpop.f32.mrb[7].mxu0  ;;  %v1632_v63 = vshrl.u32 %v1609_v61, 16  ;;  %v1635_v0 = vshll.u32 %v1609_v61, 16 }
 0x1f9   : > { %v1548_v1 = vadd.f32 %v4164_v24, %v1509_v62  ;;  %v1510_v42 = vmul.f32 %v4159_v54, %v1358_v29  ;;  %1851 = vrot.lane.b32.xlu0 %v1608_v47, %s3637_s30  ;;  %v1625_v43 = vshrl.u32 %v1608_v47, 16  ;;  %v1628_v4 = vshll.u32 %v1608_v47, 16 }
 0x1fa   : > { %v1551_v58 = vadd.f32 %v4164_v24, %v1512_v39  ;;  %v1770_v9 = vrot.slane %v1635_v0, 1  ;;  %v1634_v5 = vrot.slane %v1632_v63, 7  ;;  %v1582_v10 = vmax.f32 %v1550_v49, 0.0 }
 0x1fb   : > { %v1549_v2 = vadd.f32 %v4164_v24, %v1510_v42  ;;  %v1768_v11 = vrot.slane %v1628_v4, 1  ;;  %v1627_v12 = vrot.slane %v1625_v43, 7  ;;  %v1580_v27 = vmax.f32 %v1548_v1, 0.0 }
 0x1fc   : > { %v1583_v15 = vmax.f32 %v1551_v58, 0.0  ;;  %v1771_v48 = vor.u32 %v1770_v9, %v1632_v63  ;;  %v4188_v20 = vor.u32 %v1635_v0, %v1634_v5 }
 0x1fd   : > { %v1581_v28 = vmax.f32 %v1549_v2, 0.0  ;;  %v3322_v33 = vpop.f32.mrb[8].mxu0  ;;  %v1769_v31 = vor.u32 %v1768_v11, %v1625_v43  ;;  %v4196_v23 = vor.u32 %v1628_v4, %v1627_v12 }
 0x1fe   : > { %v1515_v32 = vmul.f32 %v3322_v33, %v4159_v54  ;;  %v1371_v25 = vpop.f32.mrb[9].mxu0  ;;  %v1817_v34 = vsel %vm3729_vm2, %v1771_v48, 0  ;;  %v1611_v35 = vpack.c.bf16 %v1583_v15, %v1582_v10 }
 0x1ff   : > { %v1513_v13 = vmul.f32 %v4159_v54, %v1371_v25  ;;  %1901 = vrot.lane.b32.xlu1 %v1817_v34, %s3638_s8  ;;  %v3323_v57 = vpop.f32.mrb[10].mxu0  ;;  %v1816_v56 = vsel %vm3729_vm2, %v1769_v31, 0  ;;  %v1610_v44 = vpack.c.bf16 %v1581_v28, %v1580_v27 }
 0x200   : > { %v1554_v3 = vadd.f32 %v4164_v24, %v1515_v32  ;;  %v1516_v6 = vmul.f32 %v3323_v57, %v4159_v54  ;;  %1899 = vrot.lane.b32.xlu0 %v1816_v56, %s3638_s8  ;;  %v1374_v16 = vpop.f32.mrb[11].mxu0  ;;  %v1646_v36 = vshrl.u32 %v1611_v35, 16  ;;  %v1649_v40 = vshll.u32 %v1611_v35, 16 }
 0x201   : > { %v1552_v8 = vadd.f32 %v4164_v24, %v1513_v13  ;;  %v1514_v45 = vmul.f32 %v4159_v54, %v1374_v16  ;;  %v1639_v17 = vshrl.u32 %v1610_v44, 16  ;;  %v1642_v37 = vshll.u32 %v1610_v44, 16 }
 0x202   : > { %v1555_v41 = vadd.f32 %v4164_v24, %v1516_v6  ;;  %v1774_v19 = vrot.slane %v1649_v40, 1  ;;  %v1648_v50 = vrot.slane %v1646_v36, 7  ;;  %v1586_v60 = vmax.f32 %v1554_v3, 0.0 }
 0x203   : > { %v1553_v51 = vadd.f32 %v4164_v24, %v1514_v45  ;;  %1857 = vrot.lane.b32.xlu1 %v1611_v35, %s3637_s30  ;;  %v1772_v38 = vrot.slane %v1642_v37, 1  ;;  %v1641_v14 = vrot.slane %v1639_v17, 7  ;;  %v1584_v21 = vmax.f32 %v1552_v8, 0.0 }
 0x204   : > { %v1587_v52 = vmax.f32 %v1555_v41, 0.0  ;;  %1855 = vrot.lane.b32.xlu0 %v1610_v44, %s3637_s30  ;;  %v1775_v53 = vor.u32 %v1774_v19, %v1646_v36  ;;  %v4216_v55 = vor.u32 %v1649_v40, %v1648_v50 }
 0x205   : > { %v1585_v30 = vmax.f32 %v1553_v51, 0.0  ;;  %v3326_v61 = vpop.f32.mrb[12].mxu0  ;;  %v1773_v62 = vor.u32 %v1772_v38, %v1639_v17  ;;  %v4218_v46 = vor.u32 %v1642_v37, %v1641_v14 }
 0x206   : > { %v1519_v47 = vmul.f32 %v3326_v61, %v4159_v54  ;;  %v1387_v59 = vpop.f32.mrb[13].mxu0  ;;  %v1819_v49 = vsel %vm3729_vm2, %v1775_v53, 0  ;;  %v1613_v39 = vpack.c.bf16 %v1587_v52, %v1586_v60 }
 0x207   : > { %v1517_v29 = vmul.f32 %v4159_v54, %v1387_v59  ;;  %1905 = vrot.lane.b32.xlu1 %v1819_v49, %s3638_s8  ;;  %v3327_v63 = vpop.f32.mrb[14].mxu0  ;;  %v1818_v0 = vsel %vm3729_vm2, %v1773_v62, 0  ;;  %v1612_v1 = vpack.c.bf16 %v1585_v30, %v1584_v21 }
 0x208   : > { %v1558_v42 = vadd.f32 %v4164_v24, %v1519_v47  ;;  %v1520_v43 = vmul.f32 %v3327_v63, %v4159_v54  ;;  %1903 = vrot.lane.b32.xlu0 %v1818_v0, %s3638_s8  ;;  %v1390_v4 = vpop.f32.mrb[15].mxu0  ;;  %v1660_v58 = vshrl.u32 %v1613_v39, 16  ;;  %v1663_v9 = vshll.u32 %v1613_v39, 16 }
 0x209   : > { %v1556_v5 = vadd.f32 %v4164_v24, %v1517_v29  ;;  %v1518_v10 = vmul.f32 %v4159_v54, %v1390_v4  ;;  %v1653_v2 = vshrl.u32 %v1612_v1, 16  ;;  %v1656_v11 = vshll.u32 %v1612_v1, 16 }
 0x20a   : > { %v1559_v12 = vadd.f32 %v4164_v24, %v1520_v43  ;;  %v1778_v15 = vrot.slane %v1663_v9, 1  ;;  %v1662_v48 = vrot.slane %v1660_v58, 7  ;;  %v1590_v33 = vmax.f32 %v1558_v42, 0.0 }
 0x20b   : > { %v1557_v18 = vadd.f32 %v4164_v24, %v1518_v10  ;;  %1861 = vrot.lane.b32.xlu1 %v1613_v39, %s3637_s30  ;;  %v1776_v27 = vrot.slane %v1656_v11, 1  ;;  %v1655_v28 = vrot.slane %v1653_v2, 7  ;;  %v1588_v34 = vmax.f32 %v1556_v5, 0.0 }
 0x20c   : > { %v1591_v31 = vmax.f32 %v1559_v12, 0.0  ;;  %1859 = vrot.lane.b32.xlu0 %v1612_v1, %s3637_s30  ;;  %v1779_v32 = vor.u32 %v1778_v15, %v1660_v58  ;;  %v4236_v25 = vor.u32 %v1663_v9, %v1662_v48 }
 0x20d   : > { %v1589_v35 = vmax.f32 %v1557_v18, 0.0  ;;  %v3330_v13 = vpop.f32.mrb[16].mxu0  ;;  %v1777_v57 = vor.u32 %v1776_v27, %v1653_v2  ;;  %v4238_v56 = vor.u32 %v1656_v11, %v1655_v28 }
 0x20e   : > { %v1523_v44 = vmul.f32 %v3330_v13, %v4159_v54  ;;  %v1403_v3 = vpop.f32.mrb[17].mxu0  ;;  %v1821_v6 = vsel %vm3729_vm2, %v1779_v32, 0  ;;  %v1615_v16 = vpack.c.bf16 %v1591_v31, %v1590_v33 }
 0x20f   : > { %v1521_v36 = vmul.f32 %v4159_v54, %v1403_v3  ;;  %1909 = vrot.lane.b32.xlu1 %v1821_v6, %s3638_s8  ;;  %v3331_v40 = vpop.f32.mrb[18].mxu0  ;;  %v1820_v8 = vsel %vm3729_vm2, %v1777_v57, 0  ;;  %v1614_v45 = vpack.c.bf16 %v1589_v35, %v1588_v34 }
 0x210   : > { %v1562_v17 = vadd.f32 %v4164_v24, %v1523_v44  ;;  %v1524_v37 = vmul.f32 %v3331_v40, %v4159_v54  ;;  %1907 = vrot.lane.b32.xlu0 %v1820_v8, %s3638_s8  ;;  %v1406_v41 = vpop.f32.mrb[19].mxu0  ;;  %v1674_v19 = vshrl.u32 %v1615_v16, 16  ;;  %v1677_v50 = vshll.u32 %v1615_v16, 16 }
 0x211   : > { %v1560_v51 = vadd.f32 %v4164_v24, %v1521_v36  ;;  %v1522_v38 = vmul.f32 %v4159_v54, %v1406_v41  ;;  %v1667_v14 = vshrl.u32 %v1614_v45, 16  ;;  %v1670_v60 = vshll.u32 %v1614_v45, 16 }
 0x212   : > { %v1563_v52 = vadd.f32 %v4164_v24, %v1524_v37  ;;  %v1782_v53 = vrot.slane %v1677_v50, 1  ;;  %v1676_v21 = vrot.slane %v1674_v19, 7  ;;  %v1594_v47 = vmax.f32 %v1562_v17, 0.0 }
 0x213   : > { %v1561_v30 = vadd.f32 %v4164_v24, %v1522_v38  ;;  %1865 = vrot.lane.b32.xlu1 %v1615_v16, %s3637_s30  ;;  %v1780_v61 = vrot.slane %v1670_v60, 1  ;;  %v1669_v62 = vrot.slane %v1667_v14, 7  ;;  %v1592_v29 = vmax.f32 %v1560_v51, 0.0 }
 0x214   : > { %v1595_v59 = vmax.f32 %v1563_v52, 0.0  ;;  %1863 = vrot.lane.b32.xlu0 %v1614_v45, %s3637_s30  ;;  %v1783_v49 = vor.u32 %v1782_v53, %v1674_v19  ;;  %v4256_v39 = vor.u32 %v1677_v50, %v1676_v21 }
 0x215   : > { %v1593_v63 = vmax.f32 %v1561_v30, 0.0  ;;  %v3334_v0 = vpop.f32.mrb[20].mxu0  ;;  %v1781_v1 = vor.u32 %v1780_v61, %v1667_v14  ;;  %v4258_v42 = vor.u32 %v1670_v60, %v1669_v62 }
 0x216   : > { %v1527_v43 = vmul.f32 %v3334_v0, %v4159_v54  ;;  %v1419_v4 = vpop.f32.mrb[21].mxu0  ;;  %v1823_v58 = vsel %vm3729_vm2, %v1783_v49, 0  ;;  %v1617_v9 = vpack.c.bf16 %v1595_v59, %v1594_v47 }
 0x217   : > { %v1525_v5 = vmul.f32 %v4159_v54, %v1419_v4  ;;  %1913 = vrot.lane.b32.xlu1 %v1823_v58, %s3638_s8  ;;  %v3335_v10 = vpop.f32.mrb[22].mxu0  ;;  %v1822_v2 = vsel %vm3729_vm2, %v1781_v1, 0  ;;  %v1616_v11 = vpack.c.bf16 %v1593_v63, %v1592_v29 }
 0x218   : > { %v1566_v12 = vadd.f32 %v4164_v24, %v1527_v43  ;;  %v1528_v15 = vmul.f32 %v3335_v10, %v4159_v54  ;;  %1911 = vrot.lane.b32.xlu0 %v1822_v2, %s3638_s8  ;;  %v1422_v48 = vpop.f32.mrb[23].mxu0  ;;  %v1688_v18 = vshrl.u32 %v1617_v9, 16  ;;  %v1691_v27 = vshll.u32 %v1617_v9, 16 }
 0x219   : > { %v1564_v28 = vadd.f32 %v4164_v24, %v1525_v5  ;;  %v1526_v33 = vmul.f32 %v4159_v54, %v1422_v48  ;;  %v1681_v31 = vshrl.u32 %v1616_v11, 16  ;;  %v1684_v32 = vshll.u32 %v1616_v11, 16 }
 0x21a   : > { %v1567_v34 = vadd.f32 %v4164_v24, %v1528_v15  ;;  %v1786_v35 = vrot.slane %v1691_v27, 1  ;;  %v1690_v13 = vrot.slane %v1688_v18, 7  ;;  %v1598_v6 = vmax.f32 %v1566_v12, 0.0 }
 0x21b   : > { %v1565_v57 = vadd.f32 %v4164_v24, %v1526_v33  ;;  %1869 = vrot.lane.b32.xlu1 %v1617_v9, %s3637_s30  ;;  %v1784_v44 = vrot.slane %v1684_v32, 1  ;;  %v1683_v3 = vrot.slane %v1681_v31, 7  ;;  %v1596_v8 = vmax.f32 %v1564_v28, 0.0 }
 0x21c   : > { %v1599_v16 = vmax.f32 %v1567_v34, 0.0  ;;  %1867 = vrot.lane.b32.xlu0 %v1616_v11, %s3637_s30  ;;  %v1787_v36 = vor.u32 %v1786_v35, %v1688_v18  ;;  %v4276_v40 = vor.u32 %v1691_v27, %v1690_v13 }
 0x21d   : > { %v1597_v45 = vmax.f32 %v1565_v57, 0.0  ;;  %v3338_v17 = vpop.f32.mrb[24].mxu0  ;;  %v1785_v37 = vor.u32 %v1784_v44, %v1681_v31  ;;  %v4278_v41 = vor.u32 %v1684_v32, %v1683_v3 }
 0x21e   : > { %v1531_v19 = vmul.f32 %v3338_v17, %v4159_v54  ;;  %v1435_v50 = vpop.f32.mrb[25].mxu0  ;;  %v1825_v51 = vsel %vm3729_vm2, %v1787_v36, 0  ;;  %v1619_v38 = vpack.c.bf16 %v1599_v16, %v1598_v6 }
 0x21f   : > { %v1529_v14 = vmul.f32 %v4159_v54, %v1435_v50  ;;  %1917 = vrot.lane.b32.xlu1 %v1825_v51, %s3638_s8  ;;  %v3339_v60 = vpop.f32.mrb[26].mxu0  ;;  %v1824_v52 = vsel %vm3729_vm2, %v1785_v37, 0  ;;  %v1618_v53 = vpack.c.bf16 %v1597_v45, %v1596_v8 }
 0x220   : > { %v1570_v21 = vadd.f32 %v4164_v24, %v1531_v19  ;;  %v1532_v30 = vmul.f32 %v3339_v60, %v4159_v54  ;;  %1915 = vrot.lane.b32.xlu0 %v1824_v52, %s3638_s8  ;;  %v1438_v61 = vpop.f32.mrb[27].mxu0  ;;  %v1702_v62 = vshrl.u32 %v1619_v38, 16  ;;  %v1705_v47 = vshll.u32 %v1619_v38, 16 }
 0x221   : > { %v1568_v59 = vadd.f32 %v4164_v24, %v1529_v14  ;;  %v1530_v49 = vmul.f32 %v4159_v54, %v1438_v61  ;;  %v1695_v29 = vshrl.u32 %v1618_v53, 16  ;;  %v1698_v63 = vshll.u32 %v1618_v53, 16 }
 0x222   : > { %v1571_v0 = vadd.f32 %v4164_v24, %v1532_v30  ;;  %v1790_v1 = vrot.slane %v1705_v47, 1  ;;  %v1704_v43 = vrot.slane %v1702_v62, 7  ;;  %v1602_v5 = vmax.f32 %v1570_v21, 0.0 }
 0x223   : > { %v1569_v4 = vadd.f32 %v4164_v24, %v1530_v49  ;;  %1873 = vrot.lane.b32.xlu1 %v1619_v38, %s3637_s30  ;;  %v1788_v58 = vrot.slane %v1698_v63, 1  ;;  %v1697_v9 = vrot.slane %v1695_v29, 7  ;;  %v1600_v12 = vmax.f32 %v1568_v59, 0.0 }
 0x224   : > { %v1603_v10 = vmax.f32 %v1571_v0, 0.0  ;;  %1871 = vrot.lane.b32.xlu0 %v1618_v53, %s3637_s30  ;;  %v1791_v2 = vor.u32 %v1790_v1, %v1702_v62  ;;  %v4296_v11 = vor.u32 %v1705_v47, %v1704_v43 }
 0x225   : > { %v1601_v15 = vmax.f32 %v1569_v4, 0.0  ;;  %v3342_v48 = vpop.f32.mrb[28].mxu0  ;;  %v1789_v18 = vor.u32 %v1788_v58, %v1695_v29  ;;  %v4298_v27 = vor.u32 %v1698_v63, %v1697_v9 }
 0x226   : > { %v1535_v28 = vmul.f32 %v3342_v48, %v4159_v54  ;;  %v1451_v33 = vpop.f32.mrb[29].mxu0  ;;  %v1827_v31 = vsel %vm3729_vm2, %v1791_v2, 0  ;;  %v1621_v32 = vpack.c.bf16 %v1603_v10, %v1602_v5 }
 0x227   : > { %v1533_v34 = vmul.f32 %v4159_v54, %v1451_v33  ;;  %1921 = vrot.lane.b32.xlu1 %v1827_v31, %s3638_s8  ;;  %v3343_v35 = vpop.f32.mrb[30].mxu0  ;;  %v1826_v13 = vsel %vm3729_vm2, %v1789_v18, 0  ;;  %v1620_v57 = vpack.c.bf16 %v1601_v15, %v1600_v12  ;;  %v1753_v31 = vsel %vm3948_vm7, 0, %v4188_v20 }
 0x228   : > { %v1574_v44 = vadd.f32 %v4164_v24, %v1535_v28  ;;  %v1536_v3 = vmul.f32 %v3343_v35, %v4159_v54  ;;  %1919 = vrot.lane.b32.xlu0 %v1826_v13, %s3638_s8  ;;  %v1454_v6 = vpop.f32.mrb[31].mxu0  ;;  %v1716_v16 = vshrl.u32 %v1621_v32, 16  ;;  %v1719_v36 = vshll.u32 %v1621_v32, 16 }
 0x229   : > { %v1572_v8 = vadd.f32 %v4164_v24, %v1533_v34  ;;  %v1534_v45 = vmul.f32 %v4159_v54, %v1454_v6  ;;  %v1709_v17 = vshrl.u32 %v1620_v57, 16  ;;  %v1712_v37 = vshll.u32 %v1620_v57, 16 }
 0x22a   : > { %v1575_v19 = vadd.f32 %v4164_v24, %v1536_v3  ;;  %v1794_v50 = vrot.slane %v1719_v36, 1  ;;  %v1718_v51 = vrot.slane %v1716_v16, 7  ;;  %v1606_v52 = vmax.f32 %v1574_v44, 0.0 }
 0x22b   : > { %v1573_v38 = vadd.f32 %v4164_v24, %v1534_v45  ;;  %1877 = vrot.lane.b32.xlu1 %v1621_v32, %s3637_s30  ;;  %v1792_v14 = vrot.slane %v1712_v37, 1  ;;  %v1711_v60 = vrot.slane %v1709_v17, 7  ;;  %v1604_v54 = vmax.f32 %v1572_v8, 0.0 }
 0x22c   : > { %v1607_v53 = vmax.f32 %v1575_v19, 0.0  ;;  %1875 = vrot.lane.b32.xlu0 %v1620_v57, %s3637_s30  ;;  %v1795_v21 = vor.u32 %v1794_v50, %v1716_v16  ;;  %v4316_v30 = vor.u32 %v1719_v36, %v1718_v51  ;;  %v1752_v34 = vsel %vm3948_vm7, 0, %v4196_v23  ;;  %v4368_v50 = vld [vmem:[%s4726_s4 + $0x10] sm:$0x3f]  }
 0x22d   : > { %v1605_v61 = vmax.f32 %v1573_v38, 0.0  ;;  %v1793_v62 = vor.u32 %v1792_v14, %v1709_v17  ;;  %v4318_v47 = vor.u32 %v1712_v37, %v1711_v60  ;;  %v1755_v6 = vsel %vm3948_vm7, 0, %v4216_v55 }
 0x22e   : > { %v1829_v59 = vsel %vm3729_vm2, %v1795_v21, 0  ;;  %v1623_v24 = vpack.c.bf16 %v1607_v53, %v1606_v52  ;;  %v1754_v16 = vsel %vm3948_vm7, 0, %v4218_v46  ;;  %v2352_v55 = vsel %vm847_vm3, %v4194_v7, 0 }
 0x22f   : > { %1925 = vrot.lane.b32.xlu1 %v1829_v59, %s3638_s8  ;;  %v1828_v49 = vsel %vm3729_vm2, %v1793_v62, 0  ;;  %v1622_v29 = vpack.c.bf16 %v1605_v61, %v1604_v54  ;;  %v1757_v7 = vsel %vm3948_vm7, 0, %v4236_v25  ;;  %v1756_v60 = vsel %vm3948_vm7, 0, %v4238_v56 }
 0x230   : > { %1923 = vrot.lane.b32.xlu0 %v1828_v49, %s3638_s8  ;;  %v1730_v63 = vshrl.u32 %v1623_v24, 16  ;;  %v1733_v0 = vshll.u32 %v1623_v24, 16 }
 0x231   : > { %v1723_v1 = vshrl.u32 %v1622_v29, 16  ;;  %v1726_v43 = vshll.u32 %v1622_v29, 16 }
 0x232   : > { %v1798_v4 = vrot.slane %v1733_v0, 1  ;;  %v1732_v58 = vrot.slane %v1730_v63, 7 }
 0x233   : > { %1881 = vrot.lane.b32.xlu1 %v1623_v24, %s3637_s30  ;;  %v1796_v9 = vrot.slane %v1726_v43, 1  ;;  %v1725_v5 = vrot.slane %v1723_v1, 7  ;;  %v1759_v24 = vsel %vm3948_vm7, 0, %v4256_v39 }
 0x234   : > { %1879 = vrot.lane.b32.xlu0 %v1622_v29, %s3637_s30  ;;  %v1799_v10 = vor.u32 %v1798_v4, %v1730_v63  ;;  %v4328_v2 = vor.u32 %v1733_v0, %v1732_v58  ;;  %v1758_v29 = vsel %vm3948_vm7, 0, %v4258_v42 }
 0x235   : > { %v1797_v12 = vor.u32 %v1796_v9, %v1723_v1  ;;  %v4330_v15 = vor.u32 %v1726_v43, %v1725_v5  ;;  %v1761_v5 = vsel %vm3948_vm7, 0, %v4276_v40 }
 0x236   : > { %v1831_v48 = vsel %vm3729_vm2, %v1799_v10, 0 }
 0x237   : > { %1929 = vrot.lane.b32.xlu1 %v1831_v48, %s3638_s8  ;;  %v1830_v18 = vsel %vm3729_vm2, %v1797_v12, 0  ;;  %v1760_v12 = vsel %vm3948_vm7, 0, %v4278_v41 }
 0x238   : > { %1927 = vrot.lane.b32.xlu0 %v1830_v18, %s3638_s8 }
 0x26a   : > { %v1854_v28 = vpop.permute.xlu1 %1853 }
 0x26b   : > { %v1852_v33 = vpop.permute.xlu0 %1851  ;;  %v1936_v32 = vsel %vm642_vm8, %v1753_v31, %v1854_v28 }
 0x26c   : > { %v1933_v13 = vsel %vm642_vm8, %v1752_v34, %v1852_v33 }
 0x271   : > { %v1902_v35 = vpop.permute.xlu1 %1901 }
 0x272   : > { %v1983_v22 = vsel %vm691_vm9, %v1936_v32, %v1902_v35  ;;  %v1900_v57 = vpop.permute.xlu0 %1899  ;;  %v1763_v35 = vsel %vm3948_vm7, 0, %v4296_v11 }
 0x273   : > { %2029 = vst.msk [vmem:[#allocation3 + $0x10] sm:$0xff] %vm542_vm4, %v1983_v22  ;;  %v1980_v44 = vsel %vm691_vm9, %v1933_v13, %v1900_v57  ;;  %v1762_v22 = vsel %vm3948_vm7, 0, %v4298_v27 }
 0x274   : > { %2028 = vst.msk [vmem:[#allocation3 + $0x8] sm:$0xff] %vm542_vm4, %v1980_v44 }
 0x275   : > { %v1858_v3 = vpop.permute.xlu1 %1857 }
 0x276   : > { %v1856_v20 = vpop.permute.xlu0 %1855  ;;  %v1942_v23 = vsel %vm642_vm8, %v1755_v6, %v1858_v3 }
 0x277   : > { %v1939_v8 = vsel %vm642_vm8, %v1754_v16, %v1856_v20 }
 0x279   : > { %v1906_v36 = vpop.permute.xlu1 %1905 }
 0x27a   : > { %v1989_v45 = vsel %vm691_vm9, %v1942_v23, %v1906_v36  ;;  %v1904_v17 = vpop.permute.xlu0 %1903  ;;  %v4373_v46 = vld [vmem:[#allocation3 + $0x10] sm:$0xff]  ;;  %v1765_v36 = vsel %vm3948_vm7, 0, %v4316_v30 }
 0x27b   : > { %2031 = vst.msk [vmem:[#allocation3 + $0x20] sm:$0xff] %vm542_vm4, %v1989_v45  ;;  %v1986_v37 = vsel %vm691_vm9, %v1939_v8, %v1904_v17  ;;  %v4361_v19 = vld [vmem:[#allocation3 + $0x8] sm:$0xff]  ;;  %v1764_v45 = vsel %vm3948_vm7, 0, %v4318_v47 }
 0x27c   : > { %2030 = vst.msk [vmem:[#allocation3 + $0x18] sm:$0xff] %vm542_vm4, %v1986_v37  ;;  %3346 = vmatprep.mubr.msk.bf16.mxu1 %vm542_vm4, %v4361_v19 }
 0x27d   : > { %3347 = vmatmul.mubr.msk.bf16.vlgmr.msra.gmra.mrb[0].mxu1 %vm542_vm4, %v4373_v46  ;;  %v1862_v51 = vpop.permute.xlu1 %1861 }
 0x27e   : > { %3379 = vmatpush3.bf16.msra.mxu1 %v2352_v55  ;;  %v1860_v38 = vpop.permute.xlu0 %1859  ;;  %v1948_v14 = vsel %vm642_vm8, %v1757_v7, %v1862_v51 }
 0x27f   : > { %3579 = vmatprep.subr.msk.bf16.mxu1 %vm847_vm3, %v4368_v50  ;;  %v1945_v53 = vsel %vm642_vm8, %v1756_v60, %v1860_v38  ;;  %v1767_v60 = vsel %vm3948_vm7, 0, %v4328_v2 }
 0x281   : > { %v1910_v52 = vpop.permute.xlu1 %1909 }
 0x282   : > { %v1995_v21 = vsel %vm691_vm9, %v1948_v14, %v1910_v52  ;;  %v1908_v54 = vpop.permute.xlu0 %1907  ;;  %v4395_v25 = vld [vmem:[#allocation3 + $0x20] sm:$0xff] }
 0x283   : > { %2033 = vst.msk [vmem:[#allocation3 + $0x30] sm:$0xff] %vm542_vm4, %v1995_v21  ;;  %v1992_v61 = vsel %vm691_vm9, %v1945_v53, %v1908_v54  ;;  %v4390_v62 = vld [vmem:[#allocation3 + $0x18] sm:$0xff]  ;;  %v1766_v53 = vsel %vm3948_vm7, 0, %v4330_v15  ;;  %v2044_v15 = vld [vmem:[#allocation3] sm:$0xff] }
 0x284   : > { %2032 = vst.msk [vmem:[#allocation3 + $0x28] sm:$0xff] %vm542_vm4, %v1992_v61  ;;  %3350 = vmatprep.mubr.msk.bf16.mxu1 %vm542_vm4, %v4390_v62 }
 0x285   : > { %3351 = vmatmul.mubr.msk.bf16.gmra.mrb[4].mxu1 %vm542_vm4, %v4395_v25  ;;  %v1866_v56 = vpop.permute.xlu1 %1865 }
 0x286   : > { %v1864_v59 = vpop.permute.xlu0 %1863  ;;  %v1954_v49 = vsel %vm642_vm8, %v1759_v24, %v1866_v56 }
 0x287   : > { %v1951_v0 = vsel %vm642_vm8, %v1758_v29, %v1864_v59  ;;  %v2589_v29 = vsel %vm847_vm3, %v4368_v50, 0  ;;  %v4545_v50 = vld [vmem:[%s4727_s5] ss:$0 sm:$0xff] }
 0x289   : > { %v1914_v63 = vpop.permute.xlu1 %1913 }
 0x28a   : > { %v2001_v1 = vsel %vm691_vm9, %v1954_v49, %v1914_v63  ;;  %v1912_v43 = vpop.permute.xlu0 %1911  ;;  %v4415_v39 = vld [vmem:[#allocation3 + $0x30] sm:$0xff] }
 0x28b   : > { %2035 = vst.msk [vmem:[#allocation3 + $0x40] sm:$0xff] %vm542_vm4, %v2001_v1  ;;  %v1998_v4 = vsel %vm691_vm9, %v1951_v0, %v1912_v43  ;;  %v4410_v58 = vld [vmem:[#allocation3 + $0x28] sm:$0xff] }
 0x28c   : > { %2034 = vst.msk [vmem:[#allocation3 + $0x38] sm:$0xff] %vm542_vm4, %v1998_v4  ;;  %3354 = vmatprep.mubr.msk.bf16.mxu1 %vm542_vm4, %v4410_v58 }
 0x28d   : > { %3355 = vmatmul.mubr.msk.bf16.gmra.mrb[8].mxu1 %vm542_vm4, %v4415_v39  ;;  %v1870_v42 = vpop.permute.xlu1 %1869 }
 0x28e   : > { %v1868_v9 = vpop.permute.xlu0 %1867  ;;  %v1960_v10 = vsel %vm642_vm8, %v1761_v5, %v1870_v42 }
 0x28f   : > { %v1957_v18 = vsel %vm642_vm8, %v1760_v12, %v1868_v9  ;;  %v3597_v9 = vld [vmem:[%s3696_s29 + $0x10] sm:$0xff]  ;;  %v3598_v12 = vld [vmem:[%s3696_s29] sm:$0xff] }
 0x291   : > { %v1918_v48 = vpop.permute.xlu1 %1917 }
 0x292   : > { %v2007_v28 = vsel %vm691_vm9, %v1960_v10, %v1918_v48  ;;  %v1916_v33 = vpop.permute.xlu0 %1915  ;;  %v4435_v40 = vld [vmem:[#allocation3 + $0x40] sm:$0xff] }
 0x293   : > { %2037 = vst.msk [vmem:[#allocation3 + $0x50] sm:$0xff] %vm542_vm4, %v2007_v28  ;;  %v2004_v31 = vsel %vm691_vm9, %v1957_v18, %v1916_v33  ;;  %v4430_v32 = vld [vmem:[#allocation3 + $0x38] sm:$0xff]  ;;  %v3599_v33 = vld [vmem:[%s3696_s29 + $0x18] sm:$0xff] }
 0x294   : > { %2036 = vst.msk [vmem:[#allocation3 + $0x48] sm:$0xff] %vm542_vm4, %v2004_v31  ;;  %3358 = vmatprep.mubr.msk.bf16.mxu1 %vm542_vm4, %v4430_v32 }
 0x295   : > { %3359 = vmatmul.mubr.msk.bf16.gmra.mrb[12].mxu1 %vm542_vm4, %v4435_v40  ;;  %v1874_v41 = vpop.permute.xlu1 %1873 }
 0x296   : > { %v1872_v34 = vpop.permute.xlu0 %1871  ;;  %v1966_v13 = vsel %vm642_vm8, %v1763_v35, %v1874_v41 }
 0x297   : > { %v1963_v44 = vsel %vm642_vm8, %v1762_v22, %v1872_v34 }
 0x299   : > { %v1922_v57 = vpop.permute.xlu1 %1921 }
 0x29a   : > { %v2013_v3 = vsel %vm691_vm9, %v1966_v13, %v1922_v57  ;;  %v1920_v20 = vpop.permute.xlu0 %1919  ;;  %v4455_v11 = vld [vmem:[#allocation3 + $0x50] sm:$0xff] }
 0x29b   : > { %2039 = vst.msk [vmem:[#allocation3 + $0x60] sm:$0xff] %vm542_vm4, %v2013_v3  ;;  %v2010_v6 = vsel %vm691_vm9, %v1963_v44, %v1920_v20  ;;  %v4450_v23 = vld [vmem:[#allocation3 + $0x48] sm:$0xff] }
 0x29c   : > { %2038 = vst.msk [vmem:[#allocation3 + $0x58] sm:$0xff] %vm542_vm4, %v2010_v6  ;;  %3362 = vmatprep.mubr.msk.bf16.mxu1 %vm542_vm4, %v4450_v23 }
 0x29d   : > { %3363 = vmatmul.mubr.msk.bf16.gmra.mrb[16].mxu1 %vm542_vm4, %v4455_v11  ;;  %v1878_v27 = vpop.permute.xlu1 %1877 }
 0x29e   : > { %v1876_v16 = vpop.permute.xlu0 %1875  ;;  %v1972_v8 = vsel %vm642_vm8, %v1765_v36, %v1878_v27 }
 0x29f   : > { %v1969_v37 = vsel %vm642_vm8, %v1764_v45, %v1876_v16  ;;  %v3601_v16 = vld [vmem:[%s3696_s29 + $0x30] sm:$0xff]  ;;  %v3602_v45 = vld [vmem:[%s3696_s29 + $0x20] sm:$0xff] }
 0x2a1   : > { %v1926_v17 = vpop.permute.xlu1 %1925 }
 0x2a2   : > { %v2019_v55 = vsel %vm691_vm9, %v1972_v8, %v1926_v17  ;;  %v1924_v51 = vpop.permute.xlu0 %1923  ;;  %v2073_v30 = vld [vmem:[#allocation3 + $0x60] sm:$0xff] }
 0x2a3   : > { %2041 = vst.msk [vmem:[#allocation3 + $0x70] sm:$0xff] %vm542_vm4, %v2019_v55  ;;  %v2016_v38 = vsel %vm691_vm9, %v1969_v37, %v1924_v51  ;;  %v2072_v7 = vld [vmem:[#allocation3 + $0x58] sm:$0xff]  ;;  %v3603_v51 = vld [vmem:[%s3696_s29 + $0x38] sm:$0xff] }
 0x2a4   : > { %2040 = vst.msk [vmem:[#allocation3 + $0x68] sm:$0xff] %vm542_vm4, %v2016_v38  ;;  %3366 = vmatprep.mubr.msk.bf16.mxu1 %vm542_vm4, %v2072_v7 }
 0x2a5   : > { %3367 = vmatmul.mubr.msk.bf16.gmra.mrb[20].mxu1 %vm542_vm4, %v2073_v30  ;;  %v1882_v14 = vpop.permute.xlu1 %1881 }
 0x2a6   : > { %v1880_v47 = vpop.permute.xlu0 %1879  ;;  %v1978_v52 = vsel %vm642_vm8, %v1767_v60, %v1882_v14 }
 0x2a7   : > { %v1975_v54 = vsel %vm642_vm8, %v1766_v53, %v1880_v47 }
 0x2a9   : > { %v1930_v21 = vpop.permute.xlu1 %1929 }
 0x2aa   : > { %v2025_v61 = vsel %vm691_vm9, %v1978_v52, %v1930_v21  ;;  %v1928_v56 = vpop.permute.xlu0 %1927  ;;  %v2075_v2 = vld [vmem:[#allocation3 + $0x70] sm:$0xff] }
 0x2ab   : > { %2043 = vst.msk [vmem:[#allocation3 + $0x80] sm:$0xff] %vm542_vm4, %v2025_v61  ;;  %v2022_v59 = vsel %vm691_vm9, %v1975_v54, %v1928_v56  ;;  %v2074_v24 = vld [vmem:[#allocation3 + $0x68] sm:$0xff] }
 0x2ac   : > { %2042 = vst.msk [vmem:[#allocation3 + $0x78] sm:$0xff] %vm542_vm4, %v2022_v59  ;;  %3370 = vmatprep.mubr.msk.bf16.mxu1 %vm542_vm4, %v2074_v24 }
 0x2ad   : > { %3371 = vmatmul.mubr.msk.bf16.gmra.mrb[24].mxu1 %vm542_vm4, %v2075_v2 }
 0x2b2   : > { %v2077_v49 = vld [vmem:[#allocation3 + $0x80] sm:$0xff] }
 0x2b3   : > { %v2076_v26 = vld [vmem:[#allocation3 + $0x78] sm:$0xff] }
 0x2b4   : > { %3374 = vmatprep.mubr.msk.bf16.mxu1 %vm542_vm4, %v2076_v26 }
 0x2b5   : > { %3375 = vmatmul.mubr.msk.bf16.gmra.mrb[28].mxu1 %vm542_vm4, %v2077_v49 }
 0x2b6   : > { %3380 = vmatprep.mubr.msk.bf16.mxu1 %vm542_vm4, %v2044_v15  ;;  %v3605_v15 = vld [vmem:[%s3696_s29 + $0x50] sm:$0xff] }
 0x2bd   : > { %3381 = vmatmul.mubr.msk.bf16.vlgmr.msra.gmra.mrb[0].mxu1 %vm542_vm4, %v4361_v19  ;;  %v2531_v19 = vld [vmem:[#allocation3 + $0x88] sm:$0xff] }
 0x2be   : > { %3413 = vmatpush3.bf16.msra.mxu1 %v2589_v29  ;;  %3384 = vmatprep.mubr.msk.bf16.mxu1 %vm542_vm4, %v4373_v46 }
 0x2c5   : > { %3385 = vmatmul.mubr.msk.bf16.gmra.mrb[4].mxu1 %vm542_vm4, %v4390_v62 }
 0x2c6   : > { %3388 = vmatprep.mubr.msk.bf16.mxu1 %vm542_vm4, %v4395_v25 }
 0x2cd   : > { %3389 = vmatmul.mubr.msk.bf16.gmra.mrb[8].mxu1 %vm542_vm4, %v4410_v58 }
 0x2ce   : > { %3392 = vmatprep.mubr.msk.bf16.mxu1 %vm542_vm4, %v4415_v39 }
 0x2d5   : > { %3393 = vmatmul.mubr.msk.bf16.gmra.mrb[12].mxu1 %vm542_vm4, %v4430_v32 }
 0x2d6   : > { %3396 = vmatprep.mubr.msk.bf16.mxu1 %vm542_vm4, %v4435_v40 }
 0x2dd   : > { %3397 = vmatmul.mubr.msk.bf16.gmra.mrb[16].mxu1 %vm542_vm4, %v4450_v23 }
 0x2de   : > { %3400 = vmatprep.mubr.msk.bf16.mxu1 %vm542_vm4, %v4455_v11 }
 0x2e5   : > { %3401 = vmatmul.mubr.msk.bf16.gmra.mrb[20].mxu1 %vm542_vm4, %v2072_v7 }
 0x2e6   : > { %3404 = vmatprep.mubr.msk.bf16.mxu1 %vm542_vm4, %v2073_v30 }
 0x2ed   : > { %3405 = vmatmul.mubr.msk.bf16.gmra.mrb[24].mxu1 %vm542_vm4, %v2074_v24 }
 0x2ee   : > { %3408 = vmatprep.mubr.msk.bf16.mxu1 %vm542_vm4, %v2075_v2 }
 0x2f5   : > { %3409 = vmatmul.mubr.msk.bf16.gmra.mrb[28].mxu1 %vm542_vm4, %v2076_v26 }
 0x2f6   : > { %3414 = vmatprep.mubr.msk.bf16.mxu1 %vm542_vm4, %v4373_v46 }
 0x2fd   : > { %3415 = vmatmul.mubr.msk.bf16.vlgmr.msra.gmra.mrb[0].mxu1 %vm542_vm4, %v4390_v62  ;;  %v4550_v62 = vld [vmem:[%s4728_s6] ss:$0 sm:$0xff] }
 0x2fe   : > { %3418 = vmatprep.mubr.msk.bf16.mxu1 %vm542_vm4, %v4395_v25 }
 0x305   : > { %3419 = vmatmul.mubr.msk.bf16.gmra.mrb[4].mxu1 %vm542_vm4, %v4410_v58 }
 0x306   : > { %3422 = vmatprep.mubr.msk.bf16.mxu1 %vm542_vm4, %v4415_v39 }
 0x30d   : > { %3423 = vmatmul.mubr.msk.bf16.gmra.mrb[8].mxu1 %vm542_vm4, %v4430_v32 }
 0x30e   : > { %3426 = vmatprep.mubr.msk.bf16.mxu1 %vm542_vm4, %v4435_v40  ;;  %v3600_v40 = vld [vmem:[%s3696_s29 + $0x8] sm:$0xff] }
 0x315   : > { %3427 = vmatmul.mubr.msk.bf16.gmra.mrb[12].mxu1 %vm542_vm4, %v4450_v23 }
 0x316   : > { %3430 = vmatprep.mubr.msk.bf16.mxu1 %vm542_vm4, %v4455_v11 }
 0x31d   : > { %3431 = vmatmul.mubr.msk.bf16.gmra.mrb[16].mxu1 %vm542_vm4, %v2072_v7 }
 0x31e   : > { %3434 = vmatprep.mubr.msk.bf16.mxu1 %vm542_vm4, %v2073_v30  ;;  %v3604_v30 = vld [vmem:[%s3696_s29 + $0x28] sm:$0xff] }
 0x325   : > { %3435 = vmatmul.mubr.msk.bf16.gmra.mrb[20].mxu1 %vm542_vm4, %v2074_v24 }
 0x326   : > { %3438 = vmatprep.mubr.msk.bf16.mxu1 %vm542_vm4, %v2075_v2 }
 0x32d   : > { %3439 = vmatmul.mubr.msk.bf16.gmra.mrb[24].mxu1 %vm542_vm4, %v2076_v26 }
 0x32e   : > { %3442 = vmatprep.mubr.msk.bf16.mxu1 %vm542_vm4, %v2077_v49 }
 0x335   : > { %3443 = vmatmul.mubr.msk.bf16.gmra.mrb[28].mxu1 %vm542_vm4, %v2531_v19  ;;  %v3606_v19 = vld [vmem:[%s3696_s29 + $0x40] sm:$0xff] }
 0x3d0   : > { %v3416_v46 = vpop.f32.mrb[0].mxu1 }
 0x3d1   : > { %v2793_v25 = vmul.f32 %v3416_v46, %v4545_v50  ;;  %v2625_v63 = vpop.f32.mrb[1].mxu1 }
 0x3d2   : > { %v2791_v0 = vmul.f32 %v4545_v50, %v2625_v63  ;;  %v3417_v1 = vpop.f32.mrb[2].mxu1 }
 0x3d3   : > { %v2832_v43 = vadd.f32 %v4550_v62, %v2793_v25  ;;  %v2794_v4 = vmul.f32 %v3417_v1, %v4545_v50  ;;  %v2628_v58 = vpop.f32.mrb[3].mxu1 }
 0x3d4   : > { %v2830_v39 = vadd.f32 %v4550_v62, %v2791_v0  ;;  %v2792_v42 = vmul.f32 %v4545_v50, %v2628_v58  ;;  %v3607_v0 = vld [vmem:[%s3696_s29 + $0x58] sm:$0xff] }
 0x3d5   : > { %v2864_v5 = vadd.f32 %v3597_v9, %v2832_v43  ;;  %v2833_v10 = vadd.f32 %v4550_v62, %v2794_v4  ;;  %v3608_v4 = vld [vmem:[%s3696_s29 + $0x48] sm:$0xff] }
 0x3d6   : > { %v2862_v48 = vadd.f32 %v3598_v12, %v2830_v39  ;;  %v2831_v18 = vadd.f32 %v4550_v62, %v2792_v42 }
 0x3d7   : > { %v2896_v28 = vmax.f32 %v2864_v5, 0.0  ;;  %v2865_v31 = vadd.f32 %v3599_v33, %v2833_v10 }
 0x3d8   : > { %v2894_v32 = vmax.f32 %v2862_v48, 0.0  ;;  %v2863_v41 = vadd.f32 %v3600_v40, %v2831_v18  ;;  %v3420_v34 = vpop.f32.mrb[4].mxu1  ;;  %v3609_v40 = vld [vmem:[%s3696_s29 + $0x70] sm:$0xff] }
 0x3d9   : > { %2928 = vst.msk [vmem:[%s4565_s12 + $0x10] sm:$0xff] %vm642_vm8, %v2896_v28  ;;  %v2897_v35 = vmax.f32 %v2865_v31, 0.0  ;;  %v2797_v13 = vmul.f32 %v3420_v34, %v4545_v50  ;;  %v2641_v22 = vpop.f32.mrb[5].mxu1 }
 0x3da   : > { %2926 = vst.msk [vmem:[%s4565_s12] sm:$0xff] %vm642_vm8, %v2894_v32  ;;  %v2895_v57 = vmax.f32 %v2863_v41, 0.0  ;;  %v2795_v44 = vmul.f32 %v4545_v50, %v2641_v22  ;;  %v3421_v3 = vpop.f32.mrb[6].mxu1 }
 0x3db   : > { %2929 = vst.msk [vmem:[%s4565_s12 + $0x18] sm:$0xff] %vm642_vm8, %v2897_v35  ;;  %v2836_v20 = vadd.f32 %v4550_v62, %v2797_v13  ;;  %v2798_v6 = vmul.f32 %v3421_v3, %v4545_v50  ;;  %v2644_v23 = vpop.f32.mrb[7].mxu1  ;;  %v3610_v35 = vld [vmem:[%s3696_s29 + $0x60] sm:$0xff] }
 0x3dc   : > { %2927 = vst.msk [vmem:[%s4565_s12 + $0x8] sm:$0xff] %vm642_vm8, %v2895_v57  ;;  %v2834_v11 = vadd.f32 %v4550_v62, %v2795_v44  ;;  %v2796_v27 = vmul.f32 %v4545_v50, %v2644_v23  ;;  %v3611_v44 = vld [vmem:[%s3696_s29 + $0x78] sm:$0xff] }
 0x3dd   : > { %v2868_v36 = vadd.f32 %v3601_v16, %v2836_v20  ;;  %v2837_v8 = vadd.f32 %v4550_v62, %v2798_v6  ;;  %v3612_v6 = vld [vmem:[%s3696_s29 + $0x68] sm:$0xff] }
 0x3de   : > { %v2866_v17 = vadd.f32 %v3602_v45, %v2834_v11  ;;  %v2835_v37 = vadd.f32 %v4550_v62, %v2796_v27 }
 0x3df   : > { %v2900_v55 = vmax.f32 %v2868_v36, 0.0  ;;  %v2869_v38 = vadd.f32 %v3603_v51, %v2837_v8 }
 0x3e0   : > { %v2898_v7 = vmax.f32 %v2866_v17, 0.0  ;;  %v2867_v14 = vadd.f32 %v3604_v30, %v2835_v37  ;;  %v3424_v47 = vpop.f32.mrb[8].mxu1  ;;  %v3613_v30 = vld [vmem:[%s3696_s29 + $0x90] sm:$0xff] }
 0x3e1   : > { %2932 = vst.msk [vmem:[%s4565_s12 + $0x30] sm:$0xff] %vm642_vm8, %v2900_v55  ;;  %v2901_v60 = vmax.f32 %v2869_v38, 0.0  ;;  %v2801_v52 = vmul.f32 %v3424_v47, %v4545_v50  ;;  %v2657_v53 = vpop.f32.mrb[9].mxu1 }
 0x3e2   : > { %2930 = vst.msk [vmem:[%s4565_s12 + $0x20] sm:$0xff] %vm642_vm8, %v2898_v7  ;;  %v2899_v21 = vmax.f32 %v2867_v14, 0.0  ;;  %v2799_v54 = vmul.f32 %v4545_v50, %v2657_v53  ;;  %v3425_v61 = vpop.f32.mrb[10].mxu1 }
 0x3e3   : > { %2933 = vst.msk [vmem:[%s4565_s12 + $0x38] sm:$0xff] %vm642_vm8, %v2901_v60  ;;  %v2840_v56 = vadd.f32 %v4550_v62, %v2801_v52  ;;  %v2802_v59 = vmul.f32 %v3425_v61, %v4545_v50  ;;  %v2660_v24 = vpop.f32.mrb[11].mxu1  ;;  %v3614_v60 = vld [vmem:[%s3696_s29 + $0x80] sm:$0xff] }
 0x3e4   : > { %2931 = vst.msk [vmem:[%s4565_s12 + $0x28] sm:$0xff] %vm642_vm8, %v2899_v21  ;;  %v2838_v2 = vadd.f32 %v4550_v62, %v2799_v54  ;;  %v2800_v26 = vmul.f32 %v4545_v50, %v2660_v24  ;;  %v3615_v54 = vld [vmem:[%s3696_s29 + $0x98] sm:$0xff] }
 0x3e5   : > { %v2872_v49 = vadd.f32 %v3605_v15, %v2840_v56  ;;  %v2841_v29 = vadd.f32 %v4550_v62, %v2802_v59  ;;  %v3616_v59 = vld [vmem:[%s3696_s29 + $0x88] sm:$0xff] }
 0x3e6   : > { %v2870_v46 = vadd.f32 %v3606_v19, %v2838_v2  ;;  %v2839_v25 = vadd.f32 %v4550_v62, %v2800_v26 }
 0x3e7   : > { %v2904_v63 = vmax.f32 %v2872_v49, 0.0  ;;  %v2873_v1 = vadd.f32 %v3607_v0, %v2841_v29 }
 0x3e8   : > { %v2902_v43 = vmax.f32 %v2870_v46, 0.0  ;;  %v2871_v58 = vadd.f32 %v3608_v4, %v2839_v25  ;;  %v3428_v39 = vpop.f32.mrb[12].mxu1  ;;  %v3617_v4 = vld [vmem:[%s3696_s29 + $0xb0] sm:$0xff] }
 0x3e9   : > { %2936 = vst.msk [vmem:[%s4565_s12 + $0x50] sm:$0xff] %vm642_vm8, %v2904_v63  ;;  %v2905_v42 = vmax.f32 %v2873_v1, 0.0  ;;  %v2805_v9 = vmul.f32 %v3428_v39, %v4545_v50  ;;  %v2673_v5 = vpop.f32.mrb[13].mxu1 }
 0x3ea   : > { %2934 = vst.msk [vmem:[%s4565_s12 + $0x40] sm:$0xff] %vm642_vm8, %v2902_v43  ;;  %v2903_v10 = vmax.f32 %v2871_v58, 0.0  ;;  %v2803_v12 = vmul.f32 %v4545_v50, %v2673_v5  ;;  %v3429_v48 = vpop.f32.mrb[14].mxu1 }
 0x3eb   : > { %2937 = vst.msk [vmem:[%s4565_s12 + $0x58] sm:$0xff] %vm642_vm8, %v2905_v42  ;;  %v2844_v18 = vadd.f32 %v4550_v62, %v2805_v9  ;;  %v2806_v28 = vmul.f32 %v3429_v48, %v4545_v50  ;;  %v2676_v33 = vpop.f32.mrb[15].mxu1  ;;  %v3618_v42 = vld [vmem:[%s3696_s29 + $0xa0] sm:$0xff] }
 0x3ec   : > { %2935 = vst.msk [vmem:[%s4565_s12 + $0x48] sm:$0xff] %vm642_vm8, %v2903_v10  ;;  %v2842_v31 = vadd.f32 %v4550_v62, %v2803_v12  ;;  %v2804_v32 = vmul.f32 %v4545_v50, %v2676_v33  ;;  %v3619_v12 = vld [vmem:[%s3696_s29 + $0xb8] sm:$0xff] }
 0x3ed   : > { %v2876_v41 = vadd.f32 %v3609_v40, %v2844_v18  ;;  %v2845_v34 = vadd.f32 %v4550_v62, %v2806_v28  ;;  %v3620_v28 = vld [vmem:[%s3696_s29 + $0xa8] sm:$0xff] }
 0x3ee   : > { %v2874_v13 = vadd.f32 %v3610_v35, %v2842_v31  ;;  %v2843_v22 = vadd.f32 %v4550_v62, %v2804_v32 }
 0x3ef   : > { %v2908_v57 = vmax.f32 %v2876_v41, 0.0  ;;  %v2877_v3 = vadd.f32 %v3611_v44, %v2845_v34 }
 0x3f0   : > { %v2906_v20 = vmax.f32 %v2874_v13, 0.0  ;;  %v2875_v23 = vadd.f32 %v3612_v6, %v2843_v22  ;;  %v3432_v11 = vpop.f32.mrb[16].mxu1  ;;  %v3621_v6 = vld [vmem:[%s3696_s29 + $0xd0] sm:$0xff] }
 0x3f1   : > { %2940 = vst.msk [vmem:[%s4565_s12 + $0x70] sm:$0xff] %vm642_vm8, %v2908_v57  ;;  %v2909_v27 = vmax.f32 %v2877_v3, 0.0  ;;  %v2809_v16 = vmul.f32 %v3432_v11, %v4545_v50  ;;  %v2689_v36 = vpop.f32.mrb[17].mxu1 }
 0x3f2   : > { %2938 = vst.msk [vmem:[%s4565_s12 + $0x60] sm:$0xff] %vm642_vm8, %v2906_v20  ;;  %v2907_v8 = vmax.f32 %v2875_v23, 0.0  ;;  %v2807_v45 = vmul.f32 %v4545_v50, %v2689_v36  ;;  %v3433_v17 = vpop.f32.mrb[18].mxu1 }
 0x3f3   : > { %2941 = vst.msk [vmem:[%s4565_s12 + $0x78] sm:$0xff] %vm642_vm8, %v2909_v27  ;;  %v2848_v37 = vadd.f32 %v4550_v62, %v2809_v16  ;;  %v2810_v55 = vmul.f32 %v3433_v17, %v4545_v50  ;;  %v2692_v51 = vpop.f32.mrb[19].mxu1  ;;  %v3622_v27 = vld [vmem:[%s3696_s29 + $0xc0] sm:$0xff] }
 0x3f4   : > { %2939 = vst.msk [vmem:[%s4565_s12 + $0x68] sm:$0xff] %vm642_vm8, %v2907_v8  ;;  %v2846_v38 = vadd.f32 %v4550_v62, %v2807_v45  ;;  %v2808_v7 = vmul.f32 %v4545_v50, %v2692_v51  ;;  %v3623_v45 = vld [vmem:[%s3696_s29 + $0xd8] sm:$0xff] }
 0x3f5   : > { %v2880_v14 = vadd.f32 %v3613_v30, %v2848_v37  ;;  %v2849_v47 = vadd.f32 %v4550_v62, %v2810_v55  ;;  %v3624_v55 = vld [vmem:[%s3696_s29 + $0xc8] sm:$0xff] }
 0x3f6   : > { %v2878_v52 = vadd.f32 %v3614_v60, %v2846_v38  ;;  %v2847_v53 = vadd.f32 %v4550_v62, %v2808_v7 }
 0x3f7   : > { %v2912_v21 = vmax.f32 %v2880_v14, 0.0  ;;  %v2881_v61 = vadd.f32 %v3615_v54, %v2849_v47 }
 0x3f8   : > { %v2910_v56 = vmax.f32 %v2878_v52, 0.0  ;;  %v2879_v24 = vadd.f32 %v3616_v59, %v2847_v53  ;;  %v3436_v2 = vpop.f32.mrb[20].mxu1  ;;  %v3625_v59 = vld [vmem:[%s3696_s29 + $0xf0] sm:$0xff] }
 0x3f9   : > { %2944 = vst.msk [vmem:[%s4565_s12 + $0x90] sm:$0xff] %vm642_vm8, %v2912_v21  ;;  %v2913_v26 = vmax.f32 %v2881_v61, 0.0  ;;  %v2813_v15 = vmul.f32 %v3436_v2, %v4545_v50  ;;  %v2705_v49 = vpop.f32.mrb[21].mxu1 }
 0x3fa   : > { %2942 = vst.msk [vmem:[%s4565_s12 + $0x80] sm:$0xff] %vm642_vm8, %v2910_v56  ;;  %v2911_v29 = vmax.f32 %v2879_v24, 0.0  ;;  %v2811_v19 = vmul.f32 %v4545_v50, %v2705_v49  ;;  %v3437_v46 = vpop.f32.mrb[22].mxu1 }
 0x3fb   : > { %2945 = vst.msk [vmem:[%s4565_s12 + $0x98] sm:$0xff] %vm642_vm8, %v2913_v26  ;;  %v2852_v25 = vadd.f32 %v4550_v62, %v2813_v15  ;;  %v2814_v63 = vmul.f32 %v3437_v46, %v4545_v50  ;;  %v2708_v0 = vpop.f32.mrb[23].mxu1  ;;  %v3626_v26 = vld [vmem:[%s3696_s29 + $0xe0] sm:$0xff] }
 0x3fc   : > { %2943 = vst.msk [vmem:[%s4565_s12 + $0x88] sm:$0xff] %vm642_vm8, %v2911_v29  ;;  %v2850_v1 = vadd.f32 %v4550_v62, %v2811_v19  ;;  %v2812_v43 = vmul.f32 %v4545_v50, %v2708_v0  ;;  %v3627_v19 = vld [vmem:[%s3696_s29 + $0xf8] sm:$0xff] }
 0x3fd   : > { %v2884_v58 = vadd.f32 %v3617_v4, %v2852_v25  ;;  %v2853_v39 = vadd.f32 %v4550_v62, %v2814_v63  ;;  %v3628_v63 = vld [vmem:[%s3696_s29 + $0xe8] sm:$0xff] }
 0x3fe   : > { %v2882_v9 = vadd.f32 %v3618_v42, %v2850_v1  ;;  %v2851_v5 = vadd.f32 %v4550_v62, %v2812_v43 }
 0x3ff   : > { %v2916_v10 = vmax.f32 %v2884_v58, 0.0  ;;  %v2885_v48 = vadd.f32 %v3619_v12, %v2853_v39 }
 0x400   : > { %v2914_v18 = vmax.f32 %v2882_v9, 0.0  ;;  %v2883_v33 = vadd.f32 %v3620_v28, %v2851_v5  ;;  %v3440_v31 = vpop.f32.mrb[24].mxu1 }
 0x401   : > { %2948 = vst.msk [vmem:[%s4565_s12 + $0xb0] sm:$0xff] %vm642_vm8, %v2916_v10  ;;  %v2917_v32 = vmax.f32 %v2885_v48, 0.0  ;;  %v2817_v40 = vmul.f32 %v3440_v31, %v4545_v50  ;;  %v2721_v41 = vpop.f32.mrb[25].mxu1 }
 0x402   : > { %2946 = vst.msk [vmem:[%s4565_s12 + $0xa0] sm:$0xff] %vm642_vm8, %v2914_v18  ;;  %v2915_v34 = vmax.f32 %v2883_v33, 0.0  ;;  %v2815_v35 = vmul.f32 %v4545_v50, %v2721_v41  ;;  %v3441_v13 = vpop.f32.mrb[26].mxu1 }
 0x403   : > { %2949 = vst.msk [vmem:[%s4565_s12 + $0xb8] sm:$0xff] %vm642_vm8, %v2917_v32  ;;  %v2856_v22 = vadd.f32 %v4550_v62, %v2817_v40  ;;  %v2818_v57 = vmul.f32 %v3441_v13, %v4545_v50  ;;  %v2724_v44 = vpop.f32.mrb[27].mxu1 }
 0x404   : > { %2947 = vst.msk [vmem:[%s4565_s12 + $0xa8] sm:$0xff] %vm642_vm8, %v2915_v34  ;;  %v2854_v3 = vadd.f32 %v4550_v62, %v2815_v35  ;;  %v2816_v20 = vmul.f32 %v4545_v50, %v2724_v44 }
 0x405   : > { %v2888_v23 = vadd.f32 %v3621_v6, %v2856_v22  ;;  %v2857_v11 = vadd.f32 %v4550_v62, %v2818_v57 }
 0x406   : > { %v2886_v16 = vadd.f32 %v3622_v27, %v2854_v3  ;;  %v2855_v36 = vadd.f32 %v4550_v62, %v2816_v20 }
 0x407   : > { %v2920_v8 = vmax.f32 %v2888_v23, 0.0  ;;  %v2889_v17 = vadd.f32 %v3623_v45, %v2857_v11 }
 0x408   : > { %v2918_v37 = vmax.f32 %v2886_v16, 0.0  ;;  %v2887_v51 = vadd.f32 %v3624_v55, %v2855_v36  ;;  %v3444_v38 = vpop.f32.mrb[28].mxu1 }
 0x409   : > { %2952 = vst.msk [vmem:[%s4565_s12 + $0xd0] sm:$0xff] %vm642_vm8, %v2920_v8  ;;  %v2921_v7 = vmax.f32 %v2889_v17, 0.0  ;;  %v2821_v30 = vmul.f32 %v3444_v38, %v4545_v50  ;;  %v2737_v14 = vpop.f32.mrb[29].mxu1 }
 0x40a   : > { %2950 = vst.msk [vmem:[%s4565_s12 + $0xc0] sm:$0xff] %vm642_vm8, %v2918_v37  ;;  %v2919_v47 = vmax.f32 %v2887_v51, 0.0  ;;  %v2819_v60 = vmul.f32 %v4545_v50, %v2737_v14  ;;  %v3445_v52 = vpop.f32.mrb[30].mxu1 }
 0x40b   : > { %2953 = vst.msk [vmem:[%s4565_s12 + $0xd8] sm:$0xff] %vm642_vm8, %v2921_v7  ;;  %v2860_v53 = vadd.f32 %v4550_v62, %v2821_v30  ;;  %v2822_v21 = vmul.f32 %v3445_v52, %v4545_v50  ;;  %v2740_v54 = vpop.f32.mrb[31].mxu1 }
 0x40c   : > { %2951 = vst.msk [vmem:[%s4565_s12 + $0xc8] sm:$0xff] %vm642_vm8, %v2919_v47  ;;  %v2858_v61 = vadd.f32 %v4550_v62, %v2819_v60  ;;  %v2820_v56 = vmul.f32 %v4545_v50, %v2740_v54 }
 0x40d   : > { %v2892_v24 = vadd.f32 %v3625_v59, %v2860_v53  ;;  %v2861_v2 = vadd.f32 %v4550_v62, %v2822_v21 }
 0x40e   : > { %v2890_v15 = vadd.f32 %v3626_v26, %v2858_v61  ;;  %v2859_v49 = vadd.f32 %v4550_v62, %v2820_v56 }
 0x40f   : > { %v2924_v29 = vmax.f32 %v2892_v24, 0.0  ;;  %v2893_v46 = vadd.f32 %v3627_v19, %v2861_v2 }
 0x410   : > { %v2922_v25 = vmax.f32 %v2890_v15, 0.0  ;;  %v2891_v0 = vadd.f32 %v3628_v63, %v2859_v49 }
 0x411   : > { %2956 = vst.msk [vmem:[%s4565_s12 + $0xf0] sm:$0xff] %vm642_vm8, %v2924_v29  ;;  %v2925_v1 = vmax.f32 %v2893_v46, 0.0 }
 0x412   : > { %2954 = vst.msk [vmem:[%s4565_s12 + $0xe0] sm:$0xff] %vm642_vm8, %v2922_v25  ;;  %v2923_v50 = vmax.f32 %v2891_v0, 0.0 }
 0x413   : > { %2957 = vst.msk [vmem:[%s4565_s12 + $0xf8] sm:$0xff] %vm642_vm8, %v2925_v1 }
 0x414   : > { %2955 = vst.msk [vmem:[%s4565_s12 + $0xe8] sm:$0xff] %vm642_vm8, %v2923_v50 }
 0x415 PF: > { %s17_s24 = sadd.s32 1, %s3635_s24  }
 0x416   : > { %p14_p4 = scmp.ge.s32.totalorder %s17_s24, 4  }
 0x418   :  { %16 = sbr.rel (!%p14_p4) target bundleno = 1 (0x1), region = 88 }

</bundles_post_ra>
